<compile_context>
chip_gen: v7x
topology: tpu7x:2x2x1
jax: 0.10.0
libtpu: 0.0.40
codegen_flags: <defaults>
</compile_context>

<pallas_src>
import jax
import jax.numpy as jnp
from jax.experimental import pallas as pl
from jax.experimental.pallas import tpu as pltpu

# ----------------------- problem sizes (small, synthetic) -------------------
OBS_DIM = 16
HIDDEN = (32, 32)
ACT_DIM = 4
ACT_LIMIT = 2.0

LANE = 128          # lane-aligned padded width for weights / hidden activations

# Packed weight slab (bf16, shape (W_ROWS, LANE)); all row offsets are
# multiples of 16 so slices align with bf16 (16,128) tiles.
W1_R0 = 0                       # rows [0,16)    : W1 in cols [0,32), rest 0
W2_R0 = W1_R0 + OBS_DIM         # rows [16,144)  : W2 in [0:32, 0:32), rest 0
WMU_R0 = W2_R0 + LANE           # rows [144,272) : Wmu in [0:32, 0:4),  rest 0
W_ROWS = WMU_R0 + LANE          # 272 total rows
B_ROWS = 8                      # bias tile rows (one f32 (8,128) tile)


# ------------------------------- kernel -------------------------------------
def actor_kernel(obs_ref, wpack_ref, bpack_ref, act_ref):
    x = obs_ref[...].astype(jnp.bfloat16)              # (TILE_B, 16) bf16
    w1 = wpack_ref[W1_R0:W1_R0 + OBS_DIM, :]           # (16, 128) bf16
    w2 = wpack_ref[W2_R0:W2_R0 + LANE, :]               # (128, 128) bf16
    wmu = wpack_ref[WMU_R0:WMU_R0 + LANE, :]            # (128, 128) bf16
    b = bpack_ref[...]                                   # (8, 128) f32
    b1 = b[0:1, :]
    b2 = b[1:2, :]
    bmu = b[2:3, :]

    # hidden layer 1: Linear + ReLU (padded lanes stay exactly zero)
    h1 = jnp.dot(x, w1, preferred_element_type=jnp.float32) + b1
    h1 = jnp.maximum(h1, 0.0)
    # hidden layer 2: Linear + ReLU (output_activation == activation)
    h2 = jnp.dot(h1.astype(jnp.bfloat16), w2,
                 preferred_element_type=jnp.float32) + b2
    h2 = jnp.maximum(h2, 0.0)
    # mu head (contraction stays 128-lane aligned; only the store is narrow)
    mu = jnp.dot(h2.astype(jnp.bfloat16), wmu,
                 preferred_element_type=jnp.float32) + bmu
    # deterministic squashed action: store only the ACT_DIM real lanes
    act_ref[...] = (ACT_LIMIT * jnp.tanh(mu[:, :ACT_DIM])).astype(act_ref.dtype)


# ------------------------------- wrapper ------------------------------------
def _num_tensorcores():
    """2 TensorCores per chip on v7x, 1 on v5e/v6e."""
    try:
        kind = jax.devices()[0].device_kind.lower()
    except Exception:
        return 1
    return 2 if "v7" in kind else 1


def _pick_tile_b(batch, ncores):
    """One big step per TensorCore, capped at 1024 rows, 16-row aligned."""
    per_core = pl.cdiv(batch, ncores)
    tile = min(1024, per_core)
    return max(16, ((tile + 15) // 16) * 16)


def mlp_actor_critic_forward(obs, packed_params, tile_b=None):
    """Pallas equivalent of MLPActorCritic.forward(obs, deterministic=True)."""
    wpack, bpack = packed_params
    B = obs.shape[0]
    if tile_b is None:
        tile_b = _pick_tile_b(B, _num_tensorcores())
    grid = (pl.cdiv(B, tile_b),)

    flops = 2 * B * (OBS_DIM * LANE + 2 * LANE * LANE)
    bytes_accessed = int(obs.size * obs.dtype.itemsize
                         + wpack.size * 2 + bpack.size * 4
                         + B * ACT_DIM * 4)
    cost = pl.CostEstimate(flops=int(flops),
                           transcendentals=int(B * ACT_DIM),
                           bytes_accessed=bytes_accessed)

    act = pl.pallas_call(
        actor_kernel,
        out_shape=jax.ShapeDtypeStruct((B, ACT_DIM), jnp.float32),
        grid=grid,
        in_specs=[
            pl.BlockSpec((tile_b, OBS_DIM), lambda i: (i, 0)),    # obs tile
            # Grid-invariant params: constant block index -> the pipeline keeps
            # the same VMEM block across steps (no re-DMA); with grid <= 2 the
            # second buffer (~70 KiB) is negligible, so no Buffered(1) needed.
            pl.BlockSpec((W_ROWS, LANE), lambda i: (0, 0)),        # packed weights
            pl.BlockSpec((B_ROWS, LANE), lambda i: (0, 0)),        # packed biases
        ],
        out_specs=pl.BlockSpec((tile_b, ACT_DIM), lambda i: (i, 0)),
        compiler_params=pltpu.CompilerParams(
            dimension_semantics=("parallel",)),
        cost_estimate=cost,
    )(obs, wpack, bpack)

    # forward() returns (action, None, None)
    return act, None, None


# --------------------------- deterministic params ----------------------------
def init_linear(key, fan_in, fan_out):
    """Mimic nn.Linear default init: U(-1/sqrt(fan_in), 1/sqrt(fan_in))."""
    kw, kb = jax.random.split(key)
    bound = 1.0 / jnp.sqrt(float(fan_in))
    w = jax.random.uniform(kw, (fan_in, fan_out), jnp.float32, -bound, bound)
    b = jax.random.uniform(kb, (1, fan_out), jnp.float32, -bound, bound)
    return w, b


def pack_params(w1, b1, w2, b2, wmu, bmu):
    """Pack the 3 weights into one bf16 slab and the 3 biases into one f32 tile."""
    wpack = jnp.zeros((W_ROWS, LANE), jnp.float32)
    wpack = wpack.at[W1_R0:W1_R0 + OBS_DIM, :HIDDEN[0]].set(w1)
    wpack = wpack.at[W2_R0:W2_R0 + HIDDEN[0], :HIDDEN[1]].set(w2)
    wpack = wpack.at[WMU_R0:WMU_R0 + HIDDEN[1], :ACT_DIM].set(wmu)
    wpack = wpack.astype(jnp.bfloat16)

    bpack = jnp.zeros((B_ROWS, LANE), jnp.float32)
    bpack = bpack.at[0, :HIDDEN[0]].set(b1.reshape(-1))
    bpack = bpack.at[1, :HIDDEN[1]].set(b2.reshape(-1))
    bpack = bpack.at[2, :ACT_DIM].set(bmu.reshape(-1))
    return wpack, bpack


def make_params(key):
    k1, k2, k3 = jax.random.split(key, 3)
    w1, b1 = init_linear(k1, OBS_DIM, HIDDEN[0])
    w2, b2 = init_linear(k2, HIDDEN[0], HIDDEN[1])
    wmu, bmu = init_linear(k3, HIDDEN[1], ACT_DIM)
    raw = (w1, b1, w2, b2, wmu, bmu)
    # TODO(synk): log_std_layer / Normal rsample / log-prob correction and the
    # q1/q2 critics exist in __init__ but are dead code on
    # forward(deterministic=True, with_logprob=False), so they are not built.
    return raw, pack_params(*raw)


# ------------------------------ references -----------------------------------
def ref_forward_f32(obs, raw):
    w1, b1, w2, b2, wmu, bmu = raw
    h = jnp.maximum(obs @ w1 + b1, 0.0)
    h = jnp.maximum(h @ w2 + b2, 0.0)
    mu = h @ wmu + bmu
    return ACT_LIMIT * jnp.tanh(mu)


def ref_forward_bf16(obs, raw):
    """Matched-precision reference (bf16 MXU operands, f32 accumulation)."""
    w1, b1, w2, b2, wmu, bmu = raw
    bf = lambda a: a.astype(jnp.bfloat16)
    h = jnp.maximum(
        jnp.dot(bf(obs), bf(w1), preferred_element_type=jnp.float32) + b1, 0.0)
    h = jnp.maximum(
        jnp.dot(bf(h), bf(w2), preferred_element_type=jnp.float32) + b2, 0.0)
    mu = jnp.dot(bf(h), bf(wmu), preferred_element_type=jnp.float32) + bmu
    return ACT_LIMIT * jnp.tanh(mu)


if __name__ == "__main__":
    key = jax.random.PRNGKey(0)
    k_obs, k_par = jax.random.split(key)

    BATCH = 512  # v5e/v6e: one grid step; v7x: two parallel steps (one per TC)
    obs = jax.random.normal(k_obs, (BATCH, OBS_DIM), jnp.float32)
    raw_params, packed_params = make_params(k_par)

    a, v, logp = mlp_actor_critic_forward(obs, packed_params)
    a = jax.block_until_ready(a)

    assert a.shape == (BATCH, ACT_DIM)
    assert v is None and logp is None

    a_ref_matched = ref_forward_bf16(obs, raw_params)
    a_ref_f32 = ref_forward_f32(obs, raw_params)
    assert jnp.allclose(a, a_ref_matched, atol=1e-2, rtol=1e-2), \
        "mismatch vs matched-precision reference"
    assert jnp.allclose(a, a_ref_f32, atol=1e-1, rtol=1e-1), \
        "mismatch vs f32 reference"

    print("KERNEL_OK")
</pallas_src>

<mosaic_0001>
module attributes {stable_mosaic.version = 11 : i64} {
  func.func @actor_kernel(%arg0: i32, %arg1: memref<512x16xf32, #tpu.memory_space<vmem>>, %arg2: memref<272x128xbf16, #tpu.memory_space<vmem>>, %arg3: memref<8x128xf32, #tpu.memory_space<vmem>>, %arg4: memref<512x4xf32, #tpu.memory_space<vmem>>) attributes {dimension_semantics = [#tpu.dimension_semantics<parallel>], iteration_bounds = array<i64: 1>, scalar_prefetch = 0 : i64, scratch_operands = 0 : i64, tpu.core_type = #tpu.core_type<tc>, window_params = [{transform_indices = @transform_0, window_bounds = array<i64: 512, 16>}, {pipeline_mode = #tpu.pipeline_mode<synchronous>, transform_indices = @transform_1, window_bounds = array<i64: 272, 128>}, {pipeline_mode = #tpu.pipeline_mode<synchronous>, transform_indices = @transform_2, window_bounds = array<i64: 8, 128>}, {transform_indices = @transform_3, window_bounds = array<i64: 512, 4>}]} {
    %c0 = arith.constant 0 : index
    %c0_0 = arith.constant 0 : index
    %0 = vector.load %arg1[%c0, %c0_0] : memref<512x16xf32, #tpu.memory_space<vmem>>, vector<512x16xf32>
    %1 = arith.truncf %0 : vector<512x16xf32> to vector<512x16xbf16>
    %c0_1 = arith.constant 0 : index
    %c0_2 = arith.constant 0 : index
    %2 = vector.load %arg2[%c0_1, %c0_2] : memref<272x128xbf16, #tpu.memory_space<vmem>>, vector<16x128xbf16>
    %c16 = arith.constant 16 : index
    %c0_3 = arith.constant 0 : index
    %3 = vector.load %arg2[%c16, %c0_3] : memref<272x128xbf16, #tpu.memory_space<vmem>>, vector<128x128xbf16>
    %c144 = arith.constant 144 : index
    %c0_4 = arith.constant 0 : index
    %4 = vector.load %arg2[%c144, %c0_4] : memref<272x128xbf16, #tpu.memory_space<vmem>>, vector<128x128xbf16>
    %c0_5 = arith.constant 0 : index
    %c0_6 = arith.constant 0 : index
    %5 = vector.load %arg3[%c0_5, %c0_6] : memref<8x128xf32, #tpu.memory_space<vmem>>, vector<8x128xf32>
    %6 = vector.extract_strided_slice %5 {offsets = [0, 0], sizes = [1, 128], strides = [1, 1]} : vector<8x128xf32> to vector<1x128xf32>
    %7 = vector.extract_strided_slice %5 {offsets = [1, 0], sizes = [1, 128], strides = [1, 1]} : vector<8x128xf32> to vector<1x128xf32>
    %8 = vector.extract_strided_slice %5 {offsets = [2, 0], sizes = [1, 128], strides = [1, 1]} : vector<8x128xf32> to vector<1x128xf32>
    %cst = arith.constant dense<0.000000e+00> : vector<512x128xf32>
    %9 = tpu.matmul %1, %2, %cst {dimension_numbers = #tpu.dot_dimension_numbers<[1], [0], [0], [1], [0, 0, 1, 1], [], []>} : vector<512x16xbf16>, vector<16x128xbf16>, vector<512x128xf32> -> vector<512x128xf32>
    %10 = vector.broadcast %6 : vector<1x128xf32> to vector<512x128xf32>
    %11 = arith.addf %9, %10 : vector<512x128xf32>
    %cst_7 = arith.constant 0.000000e+00 : f32
    %12 = vector.broadcast %cst_7 : f32 to vector<512x128xf32>
    %13 = arith.maximumf %11, %12 : vector<512x128xf32>
    %14 = arith.truncf %13 : vector<512x128xf32> to vector<512x128xbf16>
    %cst_8 = arith.constant dense<0.000000e+00> : vector<512x128xf32>
    %15 = tpu.matmul %14, %3, %cst_8 {dimension_numbers = #tpu.dot_dimension_numbers<[1], [0], [0], [1], [0, 0, 1, 1], [], []>} : vector<512x128xbf16>, vector<128x128xbf16>, vector<512x128xf32> -> vector<512x128xf32>
    %16 = vector.broadcast %7 : vector<1x128xf32> to vector<512x128xf32>
    %17 = arith.addf %15, %16 : vector<512x128xf32>
    %cst_9 = arith.constant 0.000000e+00 : f32
    %18 = vector.broadcast %cst_9 : f32 to vector<512x128xf32>
    %19 = arith.maximumf %17, %18 : vector<512x128xf32>
    %20 = arith.truncf %19 : vector<512x128xf32> to vector<512x128xbf16>
    %cst_10 = arith.constant dense<0.000000e+00> : vector<512x128xf32>
    %21 = tpu.matmul %20, %4, %cst_10 {dimension_numbers = #tpu.dot_dimension_numbers<[1], [0], [0], [1], [0, 0, 1, 1], [], []>} : vector<512x128xbf16>, vector<128x128xbf16>, vector<512x128xf32> -> vector<512x128xf32>
    %22 = vector.broadcast %8 : vector<1x128xf32> to vector<512x128xf32>
    %23 = arith.addf %21, %22 : vector<512x128xf32>
    %24 = vector.extract_strided_slice %23 {offsets = [0, 0], sizes = [512, 4], strides = [1, 1]} : vector<512x128xf32> to vector<512x4xf32>
    %25 = math.tanh %24 : vector<512x4xf32>
    %cst_11 = arith.constant 2.000000e+00 : f32
    %26 = vector.broadcast %cst_11 : f32 to vector<512x4xf32>
    %27 = arith.mulf %26, %25 : vector<512x4xf32>
    %c0_12 = arith.constant 0 : index
    %c0_13 = arith.constant 0 : index
    %28 = vector.load %arg4[%c0_12, %c0_13] : memref<512x4xf32, #tpu.memory_space<vmem>>, vector<512x4xf32>
    tpu.vector_store %arg4[%c0_12, %c0_13], %27 {strides = array<i32>} : memref<512x4xf32, #tpu.memory_space<vmem>>, vector<512x4xf32>,
    return
  }
  func.func @transform_0(%arg0: i32) -> (i32, i32) {
    %c0_i32 = arith.constant 0 : i32
    %c0_i32_0 = arith.constant 0 : i32
    return %arg0, %c0_i32 : i32, i32
  }
  func.func @transform_1(%arg0: i32) -> (i32, i32) {
    %c0_i32 = arith.constant 0 : i32
    %c0_i32_0 = arith.constant 0 : i32
    %c0_i32_1 = arith.constant 0 : i32
    return %c0_i32, %c0_i32_0 : i32, i32
  }
  func.func @transform_2(%arg0: i32) -> (i32, i32) {
    %c0_i32 = arith.constant 0 : i32
    %c0_i32_0 = arith.constant 0 : i32
    %c0_i32_1 = arith.constant 0 : i32
    return %c0_i32, %c0_i32_0 : i32, i32
  }
  func.func @transform_3(%arg0: i32) -> (i32, i32) {
    %c0_i32 = arith.constant 0 : i32
    %c0_i32_0 = arith.constant 0 : i32
    return %arg0, %c0_i32 : i32, i32
  }
}

</mosaic_0001>

<bundles_post_ra>
// kernel: tpu_custom_call.1
= control target key start
LH: loop header
LB: loop body
LE: loop exit
PB: predicated region body
PF: predicated region fallthrough
CT: control target
= control target key end

     0   :  { %vm156_vm0 = vcmask 130048   ;;  %vm1544_vm1 = vcmask 31744   ;;  %s2943_s1 = inlined_call_operand.vmem [shape: bf16[272,128], index: 1, kind: input, shape index: {}]   ;;  %s2944_s0 = inlined_call_operand.vmem [shape: f32[512,16], index: 0, kind: input, shape index: {}]   ;;  %s2945_s2 = inlined_call_operand.vmem [shape: f32[8,128], index: 2, kind: input, shape index: {}]   ;;  %s2946_s3 = inlined_call_operand.vmem [shape: f32[512,4], index: 3, kind: output, shape index: {}]  }
   0x1   :  { %v2003_v0 = vld [vmem:[%s2943_s1] sm:$0xff]   ;;  %v16_v2 = vld [vmem:[%s2944_s0 + $0x8] sm:$0xff]  ;;  %v17_v3 = vld [vmem:[%s2944_s0 + $0x10] sm:$0xff] }
   0x2   :  { %v15_v1 = vld [vmem:[%s2944_s0] sm:$0xff]  ;;  %1775 = vmatprep.subr.bf16.mxu0 %v2003_v0  ;;  %v18_v5 = vld [vmem:[%s2944_s0 + $0x18] sm:$0xff]  ;;  %v20_v7 = vld [vmem:[%s2944_s0 + $0x28] sm:$0xff]  ;;  %2001 = vmatprep.subr.bf16.mxu1 %v2003_v0 }
   0x3   :  { %v79_v4 = vpack.c.bf16 %v16_v2, %v15_v1  ;;  %v19_v6 = vld [vmem:[%s2944_s0 + $0x20] sm:$0xff]  ;;  %1776 = vmatpush3.bf16.msra.mxu0 %v2003_v0  ;;  %v80_v8 = vpack.c.bf16 %v18_v5, %v17_v3  ;;  %2002 = vmatpush3.bf16.msra.mxu1 %v2003_v0  ;;  %v21_v10 = vld [vmem:[%s2944_s0 + $0x30] sm:$0xff]  ;;  %v22_v11 = vld [vmem:[%s2944_s0 + $0x38] sm:$0xff] }
   0x4   :  { %v81_v9 = vpack.c.bf16 %v20_v7, %v19_v6  ;;  %v23_v12 = vld [vmem:[%s2944_s0 + $0x40] sm:$0xff]  ;;  %v24_v13 = vld [vmem:[%s2944_s0 + $0x48] sm:$0xff]  ;;  %v82_v14 = vpack.c.bf16 %v22_v11, %v21_v10  ;;  %v49_v18 = vld [vmem:[%s2944_s0 + $0x110] sm:$0xff] }
   0x5   :  { %1777 = vmatprep.mubr.msk.bf16.mxu0 %vm156_vm0, %v79_v4  ;;  %v83_v15 = vpack.c.bf16 %v24_v13, %v23_v12  ;;  %v47_v16 = vld [vmem:[%s2944_s0 + $0x100] sm:$0xff]  ;;  %v48_v17 = vld [vmem:[%s2944_s0 + $0x108] sm:$0xff]  ;;  %v50_v19 = vld [vmem:[%s2944_s0 + $0x118] sm:$0xff] }
   0x6   :  { %1778 = vmatmul.mubr.msk.bf16.vlgmr.msra.gmra.mrb[0].mxu0 %vm156_vm0, %v80_v8  ;;  %v95_v20 = vpack.c.bf16 %v48_v17, %v47_v16  ;;  %v96_v21 = vpack.c.bf16 %v50_v19, %v49_v18  ;;  %v51_v22 = vld [vmem:[%s2944_s0 + $0x120] sm:$0xff]  ;;  %v52_v23 = vld [vmem:[%s2944_s0 + $0x128] sm:$0xff]  ;;  %v25_v25 = vld [vmem:[%s2944_s0 + $0x50] sm:$0xff] }
   0x7   :  { %1781 = vmatprep.mubr.msk.bf16.mxu0 %vm156_vm0, %v81_v9  ;;  %v97_v24 = vpack.c.bf16 %v52_v23, %v51_v22  ;;  %v26_v26 = vld [vmem:[%s2944_s0 + $0x58] sm:$0xff]  ;;  %v27_v27 = vld [vmem:[%s2944_s0 + $0x60] sm:$0xff]  ;;  %v28_v28 = vld [vmem:[%s2944_s0 + $0x68] sm:$0xff] }
   0x8   :  { %1809 = vmatprep.mubr.msk.bf16.mxu1 %vm156_vm0, %v95_v20  ;;  %v53_v29 = vld [vmem:[%s2944_s0 + $0x130] sm:$0xff]  ;;  %v54_v30 = vld [vmem:[%s2944_s0 + $0x138] sm:$0xff]  ;;  %v84_v31 = vpack.c.bf16 %v26_v26, %v25_v25  ;;  %v55_v32 = vld [vmem:[%s2944_s0 + $0x140] sm:$0xff]  ;;  %v85_v34 = vpack.c.bf16 %v28_v28, %v27_v27 }
   0x9   :  { %1810 = vmatmul.mubr.msk.bf16.vlgmr.msra.gmra.mrb[0].mxu1 %vm156_vm0, %v96_v21  ;;  %v56_v33 = vld [vmem:[%s2944_s0 + $0x148] sm:$0xff]  ;;  %v98_v35 = vpack.c.bf16 %v54_v30, %v53_v29  ;;  %v29_v36 = vld [vmem:[%s2944_s0 + $0x70] sm:$0xff]  ;;  %v30_v37 = vld [vmem:[%s2944_s0 + $0x78] sm:$0xff] }
   0xa   :  { %1813 = vmatprep.mubr.msk.bf16.mxu1 %vm156_vm0, %v97_v24  ;;  %v99_v38 = vpack.c.bf16 %v56_v33, %v55_v32  ;;  %v31_v39 = vld [vmem:[%s2944_s0 + $0x80] sm:$0xff]  ;;  %v32_v40 = vld [vmem:[%s2944_s0 + $0x88] sm:$0xff]  ;;  %v57_v41 = vld [vmem:[%s2944_s0 + $0x150] sm:$0xff]  ;;  %v86_v46 = vpack.c.bf16 %v30_v37, %v29_v36 }
   0xb   :  { %v58_v42 = vld [vmem:[%s2944_s0 + $0x158] sm:$0xff]  ;;  %v2004_v43 = vld [vmem:[%s2943_s1 + $0x8] sm:$0xff]   ;;  %v2005_v44 = vld [vmem:[%s2943_s1 + $0x10] sm:$0xff]   ;;  %v87_v48 = vpack.c.bf16 %v32_v40, %v31_v39 }
   0xc   :  { %v59_v45 = vld [vmem:[%s2944_s0 + $0x160] sm:$0xff]  ;;  %1841 = vmatprep.subr.bf16.mxu1 %v2004_v43  ;;  %v60_v47 = vld [vmem:[%s2944_s0 + $0x168] sm:$0xff]  ;;  %v2006_v49 = vld [vmem:[%s2943_s1 + $0x18] sm:$0xff]   ;;  %v100_v50 = vpack.c.bf16 %v58_v42, %v57_v41  ;;  %v146_v41 = vlaneseq }
   0xd   :  { %1842 = vmatpush3.bf16.msra.mxu1 %v2004_v43  ;;  %v33_v51 = vld [vmem:[%s2944_s0 + $0x90] sm:$0xff]  ;;  %v34_v52 = vld [vmem:[%s2944_s0 + $0x98] sm:$0xff]  ;;  %v101_v53 = vpack.c.bf16 %v60_v47, %v59_v45  ;;  %v2007_v54 = vld [vmem:[%s2943_s1 + $0x20] sm:$0xff]  }
   0xe   :  { %1782 = vmatmul.mubr.msk.bf16.gmra.mrb[4].mxu0 %vm156_vm0, %v82_v14  ;;  %1843 = vmatprep.subr.bf16.mxu1 %v2005_v44  ;;  %v35_v55 = vld [vmem:[%s2944_s0 + $0xa0] sm:$0xff]  ;;  %v36_v56 = vld [vmem:[%s2944_s0 + $0xa8] sm:$0xff]  ;;  %v61_v57 = vld [vmem:[%s2944_s0 + $0x170] sm:$0xff]  ;;  %v88_v61 = vpack.c.bf16 %v34_v52, %v33_v51  ;;  %v2420_v42 = vshrl.u32 %v146_v41, 7 }
   0xf   :  { %1785 = vmatprep.mubr.msk.bf16.mxu0 %vm156_vm0, %v83_v15  ;;  %v62_v58 = vld [vmem:[%s2944_s0 + $0x178] sm:$0xff]  ;;  %v63_v59 = vld [vmem:[%s2944_s0 + $0x180] sm:$0xff]  ;;  %v64_v60 = vld [vmem:[%s2944_s0 + $0x188] sm:$0xff]  ;;  %v89_v62 = vpack.c.bf16 %v36_v56, %v35_v55 }
  0x10   :  { %v2008_v63 = vld [vmem:[%s2943_s1 + $0x28] sm:$0xff]   ;;  %v102_v0 = vpack.c.bf16 %v62_v58, %v61_v57  ;;  %v103_v1 = vpack.c.bf16 %v64_v60, %v63_v59  ;;  %v37_v2 = vld [vmem:[%s2944_s0 + $0xb0] sm:$0xff]  ;;  %v38_v3 = vld [vmem:[%s2944_s0 + $0xb8] sm:$0xff]  ;;  %v148_v43 = vsub.s32 0, %v2420_v42 }
  0x11   :  { %1814 = vmatmul.mubr.msk.bf16.gmra.mrb[4].mxu1 %vm156_vm0, %v98_v35  ;;  %v2009_v4 = vld [vmem:[%s2943_s1 + $0x30] sm:$0xff]   ;;  %v39_v5 = vld [vmem:[%s2944_s0 + $0xc0] sm:$0xff]  ;;  %v40_v6 = vld [vmem:[%s2944_s0 + $0xc8] sm:$0xff]  ;;  %v90_v9 = vpack.c.bf16 %v38_v3, %v37_v2 }
  0x12   :  { %1817 = vmatprep.mubr.msk.bf16.mxu1 %vm156_vm0, %v99_v38  ;;  %1844 = vmatpush3.bf16.msra.mxu1 %v2005_v44  ;;  %v65_v7 = vld [vmem:[%s2944_s0 + $0x190] sm:$0xff]  ;;  %v66_v8 = vld [vmem:[%s2944_s0 + $0x198] sm:$0xff]  ;;  %v67_v10 = vld [vmem:[%s2944_s0 + $0x1a0] sm:$0xff]  ;;  %v91_v12 = vpack.c.bf16 %v40_v6, %v39_v5 }
  0x13   :  { %1845 = vmatprep.subr.bf16.mxu1 %v2006_v49  ;;  %v68_v11 = vld [vmem:[%s2944_s0 + $0x1a8] sm:$0xff]  ;;  %v2010_v13 = vld [vmem:[%s2943_s1 + $0x38] sm:$0xff]   ;;  %v104_v14 = vpack.c.bf16 %v66_v8, %v65_v7  ;;  %v41_v16 = vld [vmem:[%s2944_s0 + $0xd0] sm:$0xff] }
  0x14   :  { %v105_v15 = vpack.c.bf16 %v68_v11, %v67_v10  ;;  %v42_v17 = vld [vmem:[%s2944_s0 + $0xd8] sm:$0xff]  ;;  %v43_v18 = vld [vmem:[%s2944_s0 + $0xe0] sm:$0xff]  ;;  %v44_v19 = vld [vmem:[%s2944_s0 + $0xe8] sm:$0xff] }
  0x15   :  { %v69_v20 = vld [vmem:[%s2944_s0 + $0x1b0] sm:$0xff]  ;;  %v70_v21 = vld [vmem:[%s2944_s0 + $0x1b8] sm:$0xff]  ;;  %v92_v22 = vpack.c.bf16 %v42_v17, %v41_v16  ;;  %v71_v23 = vld [vmem:[%s2944_s0 + $0x1c0] sm:$0xff]  ;;  %v93_v25 = vpack.c.bf16 %v44_v19, %v43_v18 }
  0x16   :  { %1786 = vmatmul.mubr.msk.bf16.gmra.mrb[8].mxu0 %vm156_vm0, %v84_v31  ;;  %1846 = vmatpush3.bf16.msra.mxu1 %v2006_v49  ;;  %v72_v24 = vld [vmem:[%s2944_s0 + $0x1c8] sm:$0xff]  ;;  %v106_v26 = vpack.c.bf16 %v70_v21, %v69_v20  ;;  %v45_v28 = vld [vmem:[%s2944_s0 + $0xf0] sm:$0xff]  ;;  %v46_v29 = vld [vmem:[%s2944_s0 + $0xf8] sm:$0xff] }
  0x17   :  { %1789 = vmatprep.mubr.msk.bf16.mxu0 %vm156_vm0, %v85_v34  ;;  %1847 = vmatprep.subr.bf16.mxu1 %v2007_v54  ;;  %v107_v27 = vpack.c.bf16 %v72_v24, %v71_v23  ;;  %v73_v30 = vld [vmem:[%s2944_s0 + $0x1d0] sm:$0xff]  ;;  %v74_v31 = vld [vmem:[%s2944_s0 + $0x1d8] sm:$0xff]  ;;  %v94_v32 = vpack.c.bf16 %v46_v29, %v45_v28  ;;  %v75_v33 = vld [vmem:[%s2944_s0 + $0x1e0] sm:$0xff] }
  0x18   :  { %v76_v34 = vld [vmem:[%s2944_s0 + $0x1e8] sm:$0xff]  ;;  %v108_v35 = vpack.c.bf16 %v74_v31, %v73_v30  ;;  %v77_v37 = vld [vmem:[%s2944_s0 + $0x1f0] sm:$0xff]  ;;  %v78_v38 = vld [vmem:[%s2944_s0 + $0x1f8] sm:$0xff] }
  0x19   :  { %1818 = vmatmul.mubr.msk.bf16.gmra.mrb[8].mxu1 %vm156_vm0, %v100_v50  ;;  %v109_v36 = vpack.c.bf16 %v76_v34, %v75_v33  ;;  %v110_v39 = vpack.c.bf16 %v78_v38, %v77_v37  ;;  %v2011_v40 = vld [vmem:[%s2943_s1 + $0x40] sm:$0xff]   ;;  %v2016_v24 = vld [vmem:[%s2943_s1 + $0x68] sm:$0xff]  }
  0x1a   :  { %1821 = vmatprep.mubr.msk.bf16.mxu1 %vm156_vm0, %v101_v53  ;;  %1848 = vmatpush3.bf16.msra.mxu1 %v2007_v54  ;;  %v2426_v44 = vld [vmem:[%s2945_s2] sm:$0xff]  ;;  %v2012_v53 = vld [vmem:[%s2943_s1 + $0x48] sm:$0xff]   ;;  %v2013_v54 = vld [vmem:[%s2943_s1 + $0x50] sm:$0xff]  }
  0x1b   :  { %1849 = vmatprep.subr.bf16.mxu1 %v2008_v63  ;;  %v2429_v45 = vrot.slane %v2426_v44, %v148_v43  ;;  %1921 = vmatprep.subr.bf16.mxu0 %v2012_v53 }
  0x1c   :  { %1922 = vmatpush3.bf16.msra.mxu0 %v2012_v53 }
  0x1d   :  { %1923 = vmatprep.subr.bf16.mxu0 %v2013_v54 }
  0x1e   :  { %1790 = vmatmul.mubr.msk.bf16.gmra.mrb[12].mxu0 %vm156_vm0, %v86_v46  ;;  %1850 = vmatpush3.bf16.msra.mxu1 %v2008_v63 }
  0x1f   :  { %1793 = vmatprep.mubr.msk.bf16.mxu0 %vm156_vm0, %v87_v48  ;;  %1851 = vmatprep.subr.bf16.mxu1 %v2009_v4 }
  0x20   :  { %1924 = vmatpush3.bf16.msra.mxu0 %v2013_v54 }
  0x21   :  { %1822 = vmatmul.mubr.msk.bf16.gmra.mrb[12].mxu1 %vm156_vm0, %v102_v0 }
  0x22   :  { %1825 = vmatprep.mubr.msk.bf16.mxu1 %vm156_vm0, %v103_v1  ;;  %1852 = vmatpush3.bf16.msra.mxu1 %v2009_v4 }
  0x23   :  { %1853 = vmatprep.subr.bf16.mxu1 %v2010_v13 }
  0x26   :  { %1794 = vmatmul.mubr.msk.bf16.gmra.mrb[16].mxu0 %vm156_vm0, %v88_v61  ;;  %1854 = vmatpush3.bf16.msra.mxu1 %v2010_v13  ;;  %v2014_v61 = vld [vmem:[%s2943_s1 + $0x58] sm:$0xff]  }
  0x27   :  { %1797 = vmatprep.mubr.msk.bf16.mxu0 %vm156_vm0, %v89_v62  ;;  %1855 = vmatprep.subr.bf16.mxu1 %v2011_v40 }
  0x28   :  { %1925 = vmatprep.subr.bf16.mxu0 %v2014_v61 }
  0x29   :  { %1826 = vmatmul.mubr.msk.bf16.gmra.mrb[16].mxu1 %vm156_vm0, %v104_v14  ;;  %1926 = vmatpush3.bf16.msra.mxu0 %v2014_v61 }
  0x2a   :  { %1829 = vmatprep.mubr.msk.bf16.mxu1 %vm156_vm0, %v105_v15  ;;  %1856 = vmatpush3.bf16.msra.mxu1 %v2011_v40 }
  0x2e   :  { %1798 = vmatmul.mubr.msk.bf16.gmra.mrb[20].mxu0 %vm156_vm0, %v90_v9  ;;  %v2015_v9 = vld [vmem:[%s2943_s1 + $0x60] sm:$0xff]  }
  0x2f   :  { %1801 = vmatprep.mubr.msk.bf16.mxu0 %vm156_vm0, %v91_v12  ;;  %1927 = vmatprep.subr.bf16.mxu0 %v2015_v9 }
  0x30   :  { %1928 = vmatpush3.bf16.msra.mxu0 %v2015_v9 }
  0x31   :  { %1830 = vmatmul.mubr.msk.bf16.gmra.mrb[20].mxu1 %vm156_vm0, %v106_v26  ;;  %1929 = vmatprep.subr.bf16.mxu0 %v2016_v24 }
  0x32   :  { %1833 = vmatprep.mubr.msk.bf16.mxu1 %vm156_vm0, %v107_v27 }
  0x34   :  { %1930 = vmatpush3.bf16.msra.mxu0 %v2016_v24 }
  0x36   :  { %1802 = vmatmul.mubr.msk.bf16.gmra.mrb[24].mxu0 %vm156_vm0, %v92_v22 }
  0x37   :  { %1805 = vmatprep.mubr.msk.bf16.mxu0 %vm156_vm0, %v93_v25 }
  0x39   :  { %1834 = vmatmul.mubr.msk.bf16.gmra.mrb[24].mxu1 %vm156_vm0, %v108_v35 }
  0x3a   :  { %1837 = vmatprep.mubr.msk.bf16.mxu1 %vm156_vm0, %v109_v36 }
  0x3e   :  { %1806 = vmatmul.mubr.msk.bf16.gmra.mrb[28].mxu0 %vm156_vm0, %v94_v32 }
  0x41   :  { %1838 = vmatmul.mubr.msk.bf16.gmra.mrb[28].mxu1 %vm156_vm0, %v110_v39  ;;  %v2017_v39 = vld [vmem:[%s2943_s1 + $0x70] sm:$0xff]  }
  0x42   :  { %1931 = vmatprep.subr.bf16.mxu0 %v2017_v39 }
  0x43   :  { %1932 = vmatpush3.bf16.msra.mxu0 %v2017_v39 }
  0xd9   :  { %v1779_v46 = vpop.f32.mrb[0].mxu0 }
  0xda   :  { %v296_v47 = vadd.f32 %v1779_v46, %v2429_v45  ;;  %v287_v48 = vpop.f32.mrb[1].mxu0 }
  0xdb   :  { %v288_v49 = vadd.f32 %v287_v48, %v2429_v45  ;;  %v1780_v50 = vpop.f32.mrb[2].mxu0 }
  0xdc   :  { %v299_v51 = vadd.f32 %v1780_v50, %v2429_v45  ;;  %v290_v52 = vpop.f32.mrb[3].mxu0  ;;  %v544_v56 = vmax.f32 %v296_v47, 0.0  ;;  %v1811_v4 = vpop.f32.mrb[0].mxu1 }
  0xdd   :  { %v291_v55 = vadd.f32 %v290_v52, %v2429_v45  ;;  %v542_v58 = vmax.f32 %v288_v49, 0.0  ;;  %v424_v7 = vadd.f32 %v1811_v4, %v2429_v45  ;;  %v415_v8 = vpop.f32.mrb[1].mxu1 }
  0xde   :  { %v545_v57 = vmax.f32 %v299_v51, 0.0  ;;  %v416_v11 = vadd.f32 %v415_v8, %v2429_v45  ;;  %v1812_v12 = vpop.f32.mrb[2].mxu1 }
  0xdf   :  { %v543_v59 = vmax.f32 %v291_v55, 0.0  ;;  %v576_v15 = vmax.f32 %v424_v7, 0.0  ;;  %v427_v16 = vadd.f32 %v1812_v12, %v2429_v45  ;;  %v418_v17 = vpop.f32.mrb[3].mxu1 }
  0xe0   :  { %v607_v60 = vpack.c.bf16 %v545_v57, %v544_v56  ;;  %v574_v20 = vmax.f32 %v416_v11, 0.0  ;;  %v419_v21 = vadd.f32 %v418_v17, %v2429_v45  ;;  %v2018_v57 = vld [vmem:[%s2943_s1 + $0x78] sm:$0xff]  }
  0xe1   :  { %v606_v62 = vpack.c.bf16 %v543_v59, %v542_v58  ;;  %v1783_v63 = vpop.f32.mrb[4].mxu0  ;;  %v577_v23 = vmax.f32 %v427_v16, 0.0  ;;  %1933 = vmatprep.subr.bf16.mxu0 %v2018_v57 }
  0xe2   :  { %v312_v0 = vadd.f32 %v1783_v63, %v2429_v45  ;;  %v303_v1 = vpop.f32.mrb[5].mxu0  ;;  %v575_v27 = vmax.f32 %v419_v21, 0.0  ;;  %1934 = vmatpush3.bf16.msra.mxu0 %v2018_v57 }
  0xe3   :  { %v304_v2 = vadd.f32 %v303_v1, %v2429_v45  ;;  %v1784_v3 = vpop.f32.mrb[6].mxu0  ;;  %1857 = vmatprep.mubr.bf16.mxu1 %v606_v62  ;;  %v2459_v30 = vpack.c.bf16 %v577_v23, %v576_v15 }
  0xe4   :  { %v315_v5 = vadd.f32 %v1784_v3, %v2429_v45  ;;  %v306_v6 = vpop.f32.mrb[7].mxu0  ;;  %1858 = vmatmul.mubr.bf16.vlgmr.msra.gmra.mrb[32].mxu1 %v607_v60  ;;  %v548_v13 = vmax.f32 %v312_v0, 0.0  ;;  %v2462_v33 = vpack.c.bf16 %v575_v27, %v574_v20  ;;  %v1815_v34 = vpop.f32.mrb[4].mxu1 }
  0xe5   :  { %v307_v10 = vadd.f32 %v306_v6, %v2429_v45  ;;  %v546_v18 = vmax.f32 %v304_v2, 0.0  ;;  %v440_v37 = vadd.f32 %v1815_v34, %v2429_v45  ;;  %v431_v38 = vpop.f32.mrb[5].mxu1 }
  0xe6   :  { %v549_v14 = vmax.f32 %v315_v5, 0.0  ;;  %v432_v41 = vadd.f32 %v431_v38, %v2429_v45  ;;  %v1816_v43 = vpop.f32.mrb[6].mxu1 }
  0xe7   :  { %v547_v19 = vmax.f32 %v307_v10, 0.0  ;;  %v580_v48 = vmax.f32 %v440_v37, 0.0  ;;  %v443_v49 = vadd.f32 %v1816_v43, %v2429_v45  ;;  %v434_v50 = vpop.f32.mrb[7].mxu1 }
  0xe8   :  { %v609_v22 = vpack.c.bf16 %v549_v14, %v548_v13  ;;  %v578_v53 = vmax.f32 %v432_v41, 0.0  ;;  %v435_v54 = vadd.f32 %v434_v50, %v2429_v45 }
  0xe9   :  { %v608_v25 = vpack.c.bf16 %v547_v19, %v546_v18  ;;  %v1787_v26 = vpop.f32.mrb[8].mxu0  ;;  %v581_v56 = vmax.f32 %v443_v49, 0.0 }
  0xea   :  { %v328_v28 = vadd.f32 %v1787_v26, %v2429_v45  ;;  %v319_v29 = vpop.f32.mrb[9].mxu0  ;;  %v579_v60 = vmax.f32 %v435_v54, 0.0 }
  0xeb   :  { %v320_v31 = vadd.f32 %v319_v29, %v2429_v45  ;;  %v1788_v32 = vpop.f32.mrb[10].mxu0  ;;  %1861 = vmatprep.mubr.bf16.mxu1 %v608_v25  ;;  %v2477_v63 = vpack.c.bf16 %v581_v56, %v580_v48 }
  0xec   :  { %v331_v35 = vadd.f32 %v1788_v32, %v2429_v45  ;;  %v322_v36 = vpop.f32.mrb[11].mxu0  ;;  %1862 = vmatmul.mubr.bf16.gmra.mrb[36].mxu1 %v609_v22  ;;  %v552_v46 = vmax.f32 %v328_v28, 0.0  ;;  %v2480_v2 = vpack.c.bf16 %v579_v60, %v578_v53  ;;  %v1819_v3 = vpop.f32.mrb[8].mxu1 }
  0xed   :  { %v323_v40 = vadd.f32 %v322_v36, %v2429_v45  ;;  %v550_v51 = vmax.f32 %v320_v31, 0.0  ;;  %v456_v6 = vadd.f32 %v1819_v3, %v2429_v45  ;;  %v447_v7 = vpop.f32.mrb[9].mxu1 }
  0xee   :  { %v553_v47 = vmax.f32 %v331_v35, 0.0  ;;  %v448_v9 = vadd.f32 %v447_v7, %v2429_v45  ;;  %v1820_v10 = vpop.f32.mrb[10].mxu1 }
  0xef   :  { %v551_v52 = vmax.f32 %v323_v40, 0.0  ;;  %v584_v13 = vmax.f32 %v456_v6, 0.0  ;;  %v459_v14 = vadd.f32 %v1820_v10, %v2429_v45  ;;  %v450_v15 = vpop.f32.mrb[11].mxu1 }
  0xf0   :  { %v611_v55 = vpack.c.bf16 %v553_v47, %v552_v46  ;;  %v582_v18 = vmax.f32 %v448_v9, 0.0  ;;  %v451_v19 = vadd.f32 %v450_v15, %v2429_v45 }
  0xf1   :  { %v610_v58 = vpack.c.bf16 %v551_v52, %v550_v51  ;;  %v1791_v59 = vpop.f32.mrb[12].mxu0  ;;  %v585_v21 = vmax.f32 %v459_v14, 0.0 }
  0xf2   :  { %v344_v61 = vadd.f32 %v1791_v59, %v2429_v45  ;;  %v335_v62 = vpop.f32.mrb[13].mxu0  ;;  %v583_v24 = vmax.f32 %v451_v19, 0.0 }
  0xf3   :  { %v336_v0 = vadd.f32 %v335_v62, %v2429_v45  ;;  %v1792_v1 = vpop.f32.mrb[14].mxu0  ;;  %1865 = vmatprep.mubr.bf16.mxu1 %v610_v58  ;;  %v2489_v27 = vpack.c.bf16 %v585_v21, %v584_v13 }
  0xf4   :  { %v347_v4 = vadd.f32 %v1792_v1, %v2429_v45  ;;  %v338_v5 = vpop.f32.mrb[15].mxu0  ;;  %1866 = vmatmul.mubr.bf16.gmra.mrb[40].mxu1 %v611_v55  ;;  %v556_v11 = vmax.f32 %v344_v61, 0.0  ;;  %v2492_v31 = vpack.c.bf16 %v583_v24, %v582_v18  ;;  %v1823_v32 = vpop.f32.mrb[12].mxu1 }
  0xf5   :  { %v339_v8 = vadd.f32 %v338_v5, %v2429_v45  ;;  %v554_v16 = vmax.f32 %v336_v0, 0.0  ;;  %v472_v36 = vadd.f32 %v1823_v32, %v2429_v45  ;;  %v463_v37 = vpop.f32.mrb[13].mxu1 }
  0xf6   :  { %v557_v12 = vmax.f32 %v347_v4, 0.0  ;;  %v464_v39 = vadd.f32 %v463_v37, %v2429_v45  ;;  %v1824_v40 = vpop.f32.mrb[14].mxu1 }
  0xf7   :  { %v555_v17 = vmax.f32 %v339_v8, 0.0  ;;  %v588_v46 = vmax.f32 %v472_v36, 0.0  ;;  %v475_v47 = vadd.f32 %v1824_v40, %v2429_v45  ;;  %v466_v48 = vpop.f32.mrb[15].mxu1 }
  0xf8   :  { %v613_v20 = vpack.c.bf16 %v557_v12, %v556_v11  ;;  %v586_v51 = vmax.f32 %v464_v39, 0.0  ;;  %v467_v52 = vadd.f32 %v466_v48, %v2429_v45 }
  0xf9   :  { %v612_v22 = vpack.c.bf16 %v555_v17, %v554_v16  ;;  %v1795_v23 = vpop.f32.mrb[16].mxu0  ;;  %v589_v54 = vmax.f32 %v475_v47, 0.0 }
  0xfa   :  { %v360_v25 = vadd.f32 %v1795_v23, %v2429_v45  ;;  %v351_v26 = vpop.f32.mrb[17].mxu0  ;;  %v587_v57 = vmax.f32 %v467_v52, 0.0 }
  0xfb   :  { %v352_v28 = vadd.f32 %v351_v26, %v2429_v45  ;;  %v1796_v29 = vpop.f32.mrb[18].mxu0  ;;  %1869 = vmatprep.mubr.bf16.mxu1 %v612_v22  ;;  %v2501_v60 = vpack.c.bf16 %v589_v54, %v588_v46 }
  0xfc   :  { %v363_v34 = vadd.f32 %v1796_v29, %v2429_v45  ;;  %v354_v35 = vpop.f32.mrb[19].mxu0  ;;  %1870 = vmatmul.mubr.bf16.gmra.mrb[44].mxu1 %v613_v20  ;;  %v560_v41 = vmax.f32 %v360_v25, 0.0  ;;  %v2504_v0 = vpack.c.bf16 %v587_v57, %v586_v51  ;;  %v1827_v1 = vpop.f32.mrb[16].mxu1 }
  0xfd   :  { %v355_v38 = vadd.f32 %v354_v35, %v2429_v45  ;;  %v558_v49 = vmax.f32 %v352_v28, 0.0  ;;  %v488_v5 = vadd.f32 %v1827_v1, %v2429_v45  ;;  %v479_v6 = vpop.f32.mrb[17].mxu1 }
  0xfe   :  { %v561_v43 = vmax.f32 %v363_v34, 0.0  ;;  %v480_v8 = vadd.f32 %v479_v6, %v2429_v45  ;;  %v1828_v9 = vpop.f32.mrb[18].mxu1 }
  0xff   :  { %v559_v50 = vmax.f32 %v355_v38, 0.0  ;;  %v592_v12 = vmax.f32 %v488_v5, 0.0  ;;  %v491_v13 = vadd.f32 %v1828_v9, %v2429_v45  ;;  %v482_v14 = vpop.f32.mrb[19].mxu1 }
 0x100   :  { %v615_v53 = vpack.c.bf16 %v561_v43, %v560_v41  ;;  %v590_v17 = vmax.f32 %v480_v8, 0.0  ;;  %v483_v18 = vadd.f32 %v482_v14, %v2429_v45 }
 0x101   :  { %v614_v55 = vpack.c.bf16 %v559_v50, %v558_v49  ;;  %v1799_v56 = vpop.f32.mrb[20].mxu0  ;;  %v593_v20 = vmax.f32 %v491_v13, 0.0 }
 0x102   :  { %v376_v58 = vadd.f32 %v1799_v56, %v2429_v45  ;;  %v367_v59 = vpop.f32.mrb[21].mxu0  ;;  %v591_v23 = vmax.f32 %v483_v18, 0.0 }
 0x103   :  { %v368_v61 = vadd.f32 %v367_v59, %v2429_v45  ;;  %v1800_v62 = vpop.f32.mrb[22].mxu0  ;;  %1873 = vmatprep.mubr.bf16.mxu1 %v614_v55  ;;  %v2513_v26 = vpack.c.bf16 %v593_v20, %v592_v12 }
 0x104   :  { %v379_v3 = vadd.f32 %v1800_v62, %v2429_v45  ;;  %v370_v4 = vpop.f32.mrb[23].mxu0  ;;  %1874 = vmatmul.mubr.bf16.gmra.mrb[48].mxu1 %v615_v53  ;;  %v564_v10 = vmax.f32 %v376_v58, 0.0  ;;  %v2516_v32 = vpack.c.bf16 %v591_v23, %v590_v17  ;;  %v1831_v34 = vpop.f32.mrb[20].mxu1 }
 0x105   :  { %v371_v7 = vadd.f32 %v370_v4, %v2429_v45  ;;  %v562_v15 = vmax.f32 %v368_v61, 0.0  ;;  %v504_v37 = vadd.f32 %v1831_v34, %v2429_v45  ;;  %v495_v38 = vpop.f32.mrb[21].mxu1 }
 0x106   :  { %v565_v11 = vmax.f32 %v379_v3, 0.0  ;;  %v496_v40 = vadd.f32 %v495_v38, %v2429_v45  ;;  %v1832_v41 = vpop.f32.mrb[22].mxu1 }
 0x107   :  { %v563_v16 = vmax.f32 %v371_v7, 0.0  ;;  %v596_v47 = vmax.f32 %v504_v37, 0.0  ;;  %v507_v48 = vadd.f32 %v1832_v41, %v2429_v45  ;;  %v498_v49 = vpop.f32.mrb[23].mxu1 }
 0x108   :  { %v617_v19 = vpack.c.bf16 %v565_v11, %v564_v10  ;;  %v594_v52 = vmax.f32 %v496_v40, 0.0  ;;  %v499_v53 = vadd.f32 %v498_v49, %v2429_v45 }
 0x109   :  { %v616_v21 = vpack.c.bf16 %v563_v16, %v562_v15  ;;  %v1803_v22 = vpop.f32.mrb[24].mxu0  ;;  %v597_v55 = vmax.f32 %v507_v48, 0.0 }
 0x10a   :  { %v392_v24 = vadd.f32 %v1803_v22, %v2429_v45  ;;  %v383_v25 = vpop.f32.mrb[25].mxu0  ;;  %v595_v58 = vmax.f32 %v499_v53, 0.0 }
 0x10b   :  { %v384_v28 = vadd.f32 %v383_v25, %v2429_v45  ;;  %v1804_v29 = vpop.f32.mrb[26].mxu0  ;;  %1877 = vmatprep.mubr.bf16.mxu1 %v616_v21  ;;  %v633_v62 = vpack.c.bf16 %v597_v55, %v596_v47 }
 0x10c   :  { %v395_v35 = vadd.f32 %v1804_v29, %v2429_v45  ;;  %v386_v36 = vpop.f32.mrb[27].mxu0  ;;  %1878 = vmatmul.mubr.bf16.gmra.mrb[52].mxu1 %v617_v19  ;;  %v568_v43 = vmax.f32 %v392_v24, 0.0  ;;  %v632_v4 = vpack.c.bf16 %v595_v58, %v594_v52  ;;  %v1835_v5 = vpop.f32.mrb[24].mxu1 }
 0x10d   :  { %v387_v39 = vadd.f32 %v386_v36, %v2429_v45  ;;  %v566_v50 = vmax.f32 %v384_v28, 0.0  ;;  %v520_v8 = vadd.f32 %v1835_v5, %v2429_v45  ;;  %v511_v9 = vpop.f32.mrb[25].mxu1 }
 0x10e   :  { %v569_v46 = vmax.f32 %v395_v35, 0.0  ;;  %v512_v11 = vadd.f32 %v511_v9, %v2429_v45  ;;  %v1836_v12 = vpop.f32.mrb[26].mxu1 }
 0x10f   :  { %v567_v51 = vmax.f32 %v387_v39, 0.0  ;;  %v600_v15 = vmax.f32 %v520_v8, 0.0  ;;  %v523_v16 = vadd.f32 %v1836_v12, %v2429_v45  ;;  %v514_v17 = vpop.f32.mrb[27].mxu1 }
 0x110   :  { %v619_v54 = vpack.c.bf16 %v569_v46, %v568_v43  ;;  %v598_v20 = vmax.f32 %v512_v11, 0.0  ;;  %v515_v21 = vadd.f32 %v514_v17, %v2429_v45 }
 0x111   :  { %v618_v56 = vpack.c.bf16 %v567_v51, %v566_v50  ;;  %v1807_v57 = vpop.f32.mrb[28].mxu0  ;;  %v601_v23 = vmax.f32 %v523_v16, 0.0 }
 0x112   :  { %v408_v59 = vadd.f32 %v1807_v57, %v2429_v45  ;;  %v399_v61 = vpop.f32.mrb[29].mxu0  ;;  %v599_v25 = vmax.f32 %v515_v21, 0.0 }
 0x113   :  { %v400_v1 = vadd.f32 %v399_v61, %v2429_v45  ;;  %v1808_v3 = vpop.f32.mrb[30].mxu0  ;;  %1881 = vmatprep.mubr.bf16.mxu1 %v618_v56  ;;  %v635_v28 = vpack.c.bf16 %v601_v23, %v600_v15 }
 0x114   :  { %v411_v6 = vadd.f32 %v1808_v3, %v2429_v45  ;;  %v402_v7 = vpop.f32.mrb[31].mxu0  ;;  %1882 = vmatmul.mubr.bf16.gmra.mrb[56].mxu1 %v619_v54  ;;  %v572_v13 = vmax.f32 %v408_v59, 0.0  ;;  %v634_v29 = vpack.c.bf16 %v599_v25, %v598_v20  ;;  %v1839_v34 = vpop.f32.mrb[28].mxu1 }
 0x115   :  { %v403_v10 = vadd.f32 %v402_v7, %v2429_v45  ;;  %v570_v18 = vmax.f32 %v400_v1, 0.0  ;;  %v536_v35 = vadd.f32 %v1839_v34, %v2429_v45  ;;  %v527_v36 = vpop.f32.mrb[29].mxu1 }
 0x116   :  { %v573_v14 = vmax.f32 %v411_v6, 0.0  ;;  %v528_v37 = vadd.f32 %v527_v36, %v2429_v45  ;;  %v1840_v38 = vpop.f32.mrb[30].mxu1 }
 0x117   :  { %v571_v19 = vmax.f32 %v403_v10, 0.0  ;;  %v604_v39 = vmax.f32 %v536_v35, 0.0  ;;  %v539_v40 = vadd.f32 %v1840_v38, %v2429_v45  ;;  %v530_v41 = vpop.f32.mrb[31].mxu1 }
 0x118   :  { %v621_v22 = vpack.c.bf16 %v573_v14, %v572_v13  ;;  %v602_v43 = vmax.f32 %v528_v37, 0.0  ;;  %v531_v46 = vadd.f32 %v530_v41, %v2429_v45  ;;  %v2019_v45 = vld [vmem:[%s2943_s1 + $0x80] sm:$0xff]  }
 0x119   :  { %v620_v24 = vpack.c.bf16 %v571_v19, %v570_v18  ;;  %v605_v47 = vmax.f32 %v539_v40, 0.0  ;;  %1935 = vmatprep.subr.bf16.mxu0 %v2019_v45 }
 0x11a   :  { %v603_v48 = vmax.f32 %v531_v46, 0.0  ;;  %1936 = vmatpush3.bf16.msra.mxu0 %v2019_v45 }
 0x11b   :  { %1885 = vmatprep.mubr.bf16.mxu1 %v620_v24  ;;  %v637_v49 = vpack.c.bf16 %v605_v47, %v604_v39 }
 0x11c   :  { %1886 = vmatmul.mubr.bf16.gmra.mrb[60].mxu1 %v621_v22  ;;  %v636_v50 = vpack.c.bf16 %v603_v48, %v602_v43 }
 0x11d   :  { %1889 = vmatprep.mubr.bf16.mxu1 %v2462_v33 }
 0x124   :  { %1890 = vmatmul.mubr.bf16.gmra.mrb[64].mxu1 %v2459_v30  ;;  %v640_v30 = vsub.s32 1, %v2420_v42 }
 0x125   :  { %1893 = vmatprep.mubr.bf16.mxu1 %v2480_v2 }
 0x126   :  { %v2551_v33 = vrot.slane %v2426_v44, %v640_v30 }
 0x12c   :  { %1894 = vmatmul.mubr.bf16.gmra.mrb[68].mxu1 %v2477_v63 }
 0x12d   :  { %1897 = vmatprep.mubr.bf16.mxu1 %v2492_v31 }
 0x134   :  { %1898 = vmatmul.mubr.bf16.gmra.mrb[72].mxu1 %v2489_v27 }
 0x135   :  { %1901 = vmatprep.mubr.bf16.mxu1 %v2504_v0 }
 0x13c   :  { %1902 = vmatmul.mubr.bf16.gmra.mrb[76].mxu1 %v2501_v60 }
 0x13d   :  { %1905 = vmatprep.mubr.bf16.mxu1 %v2516_v32 }
 0x144   :  { %1906 = vmatmul.mubr.bf16.gmra.mrb[80].mxu1 %v2513_v26 }
 0x145   :  { %1909 = vmatprep.mubr.bf16.mxu1 %v632_v4 }
 0x14c   :  { %1910 = vmatmul.mubr.bf16.gmra.mrb[84].mxu1 %v633_v62 }
 0x14d   :  { %1913 = vmatprep.mubr.bf16.mxu1 %v634_v29 }
 0x154   :  { %1914 = vmatmul.mubr.bf16.gmra.mrb[88].mxu1 %v635_v28 }
 0x155   :  { %1917 = vmatprep.mubr.bf16.mxu1 %v636_v50 }
 0x15c   :  { %1918 = vmatmul.mubr.bf16.gmra.mrb[92].mxu1 %v637_v49 }
 0x1b7   :  { %v1859_v63 = vpop.f32.mrb[32].mxu1 }
 0x1b8   :  { %v733_v2 = vadd.f32 %v1859_v63, %v2551_v33  ;;  %v724_v27 = vpop.f32.mrb[33].mxu1 }
 0x1b9   :  { %v725_v31 = vadd.f32 %v724_v27, %v2551_v33  ;;  %v1860_v60 = vpop.f32.mrb[34].mxu1 }
 0x1ba   :  { %v736_v0 = vadd.f32 %v1860_v60, %v2551_v33  ;;  %v727_v26 = vpop.f32.mrb[35].mxu1  ;;  %v981_v51 = vmax.f32 %v733_v2, 0.0 }
 0x1bb   :  { %v728_v32 = vadd.f32 %v727_v26, %v2551_v33  ;;  %v979_v53 = vmax.f32 %v725_v31, 0.0 }
 0x1bc   :  { %v982_v52 = vmax.f32 %v736_v0, 0.0 }
 0x1bd   :  { %v980_v54 = vmax.f32 %v728_v32, 0.0 }
 0x1be   :  { %v1044_v55 = vpack.c.bf16 %v982_v52, %v981_v51 }
 0x1bf   :  { %v1043_v56 = vpack.c.bf16 %v980_v54, %v979_v53  ;;  %v1863_v44 = vpop.f32.mrb[36].mxu1 }
 0x1c0   :  { %v749_v57 = vadd.f32 %v1863_v44, %v2551_v33  ;;  %v740_v58 = vpop.f32.mrb[37].mxu1 }
 0x1c1   :  { %v741_v59 = vadd.f32 %v740_v58, %v2551_v33  ;;  %v1864_v61 = vpop.f32.mrb[38].mxu1  ;;  %1937 = vmatprep.mubr.bf16.mxu0 %v1043_v56 }
 0x1c2   :  { %v752_v62 = vadd.f32 %v1864_v61, %v2551_v33  ;;  %v743_v1 = vpop.f32.mrb[39].mxu1  ;;  %1938 = vmatmul.mubr.bf16.vlgmr.msra.gmra.mrb[32].mxu0 %v1044_v55  ;;  %v985_v4 = vmax.f32 %v749_v57, 0.0 }
 0x1c3   :  { %v744_v3 = vadd.f32 %v743_v1, %v2551_v33  ;;  %v983_v6 = vmax.f32 %v741_v59, 0.0 }
 0x1c4   :  { %v986_v5 = vmax.f32 %v752_v62, 0.0 }
 0x1c5   :  { %v984_v7 = vmax.f32 %v744_v3, 0.0 }
 0x1c6   :  { %v1046_v8 = vpack.c.bf16 %v986_v5, %v985_v4 }
 0x1c7   :  { %v1045_v9 = vpack.c.bf16 %v984_v7, %v983_v6  ;;  %v1867_v10 = vpop.f32.mrb[40].mxu1 }
 0x1c8   :  { %v765_v11 = vadd.f32 %v1867_v10, %v2551_v33  ;;  %v756_v12 = vpop.f32.mrb[41].mxu1 }
 0x1c9   :  { %v757_v13 = vadd.f32 %v756_v12, %v2551_v33  ;;  %v1868_v14 = vpop.f32.mrb[42].mxu1  ;;  %1941 = vmatprep.mubr.bf16.mxu0 %v1045_v9 }
 0x1ca   :  { %v768_v15 = vadd.f32 %v1868_v14, %v2551_v33  ;;  %v759_v16 = vpop.f32.mrb[43].mxu1  ;;  %1942 = vmatmul.mubr.bf16.gmra.mrb[36].mxu0 %v1046_v8  ;;  %v989_v18 = vmax.f32 %v765_v11, 0.0 }
 0x1cb   :  { %v760_v17 = vadd.f32 %v759_v16, %v2551_v33  ;;  %v987_v20 = vmax.f32 %v757_v13, 0.0 }
 0x1cc   :  { %v990_v19 = vmax.f32 %v768_v15, 0.0 }
 0x1cd   :  { %v988_v21 = vmax.f32 %v760_v17, 0.0 }
 0x1ce   :  { %v1048_v22 = vpack.c.bf16 %v990_v19, %v989_v18 }
 0x1cf   :  { %v1047_v23 = vpack.c.bf16 %v988_v21, %v987_v20  ;;  %v1871_v24 = vpop.f32.mrb[44].mxu1 }
 0x1d0   :  { %v781_v25 = vadd.f32 %v1871_v24, %v2551_v33  ;;  %v772_v28 = vpop.f32.mrb[45].mxu1 }
 0x1d1   :  { %v773_v29 = vadd.f32 %v772_v28, %v2551_v33  ;;  %v1872_v34 = vpop.f32.mrb[46].mxu1  ;;  %1945 = vmatprep.mubr.bf16.mxu0 %v1047_v23 }
 0x1d2   :  { %v784_v35 = vadd.f32 %v1872_v34, %v2551_v33  ;;  %v775_v36 = vpop.f32.mrb[47].mxu1  ;;  %1946 = vmatmul.mubr.bf16.gmra.mrb[40].mxu0 %v1048_v22  ;;  %v993_v38 = vmax.f32 %v781_v25, 0.0 }
 0x1d3   :  { %v776_v37 = vadd.f32 %v775_v36, %v2551_v33  ;;  %v991_v40 = vmax.f32 %v773_v29, 0.0 }
 0x1d4   :  { %v994_v39 = vmax.f32 %v784_v35, 0.0 }
 0x1d5   :  { %v992_v41 = vmax.f32 %v776_v37, 0.0 }
 0x1d6   :  { %v1050_v43 = vpack.c.bf16 %v994_v39, %v993_v38 }
 0x1d7   :  { %v1049_v46 = vpack.c.bf16 %v992_v41, %v991_v40  ;;  %v1875_v47 = vpop.f32.mrb[48].mxu1 }
 0x1d8   :  { %v797_v48 = vadd.f32 %v1875_v47, %v2551_v33  ;;  %v788_v49 = vpop.f32.mrb[49].mxu1 }
 0x1d9   :  { %v789_v50 = vadd.f32 %v788_v49, %v2551_v33  ;;  %v1876_v45 = vpop.f32.mrb[50].mxu1  ;;  %1949 = vmatprep.mubr.bf16.mxu0 %v1049_v46 }
 0x1da   :  { %v800_v30 = vadd.f32 %v1876_v45, %v2551_v33  ;;  %v791_v63 = vpop.f32.mrb[51].mxu1  ;;  %1950 = vmatmul.mubr.bf16.gmra.mrb[44].mxu0 %v1050_v43  ;;  %v997_v27 = vmax.f32 %v797_v48, 0.0 }
 0x1db   :  { %v792_v2 = vadd.f32 %v791_v63, %v2551_v33  ;;  %v995_v60 = vmax.f32 %v789_v50, 0.0 }
 0x1dc   :  { %v998_v31 = vmax.f32 %v800_v30, 0.0 }
 0x1dd   :  { %v996_v0 = vmax.f32 %v792_v2, 0.0 }
 0x1de   :  { %v1052_v26 = vpack.c.bf16 %v998_v31, %v997_v27 }
 0x1df   :  { %v1051_v32 = vpack.c.bf16 %v996_v0, %v995_v60  ;;  %v1879_v51 = vpop.f32.mrb[52].mxu1 }
 0x1e0   :  { %v813_v52 = vadd.f32 %v1879_v51, %v2551_v33  ;;  %v804_v53 = vpop.f32.mrb[53].mxu1 }
 0x1e1   :  { %v805_v54 = vadd.f32 %v804_v53, %v2551_v33  ;;  %v1880_v55 = vpop.f32.mrb[54].mxu1  ;;  %1953 = vmatprep.mubr.bf16.mxu0 %v1051_v32 }
 0x1e2   :  { %v816_v56 = vadd.f32 %v1880_v55, %v2551_v33  ;;  %v807_v44 = vpop.f32.mrb[55].mxu1  ;;  %1954 = vmatmul.mubr.bf16.gmra.mrb[48].mxu0 %v1052_v26  ;;  %v1001_v58 = vmax.f32 %v813_v52, 0.0 }
 0x1e3   :  { %v808_v57 = vadd.f32 %v807_v44, %v2551_v33  ;;  %v999_v61 = vmax.f32 %v805_v54, 0.0 }
 0x1e4   :  { %v1002_v59 = vmax.f32 %v816_v56, 0.0 }
 0x1e5   :  { %v1000_v62 = vmax.f32 %v808_v57, 0.0 }
 0x1e6   :  { %v1054_v1 = vpack.c.bf16 %v1002_v59, %v1001_v58 }
 0x1e7   :  { %v1053_v3 = vpack.c.bf16 %v1000_v62, %v999_v61  ;;  %v1883_v4 = vpop.f32.mrb[56].mxu1 }
 0x1e8   :  { %v829_v5 = vadd.f32 %v1883_v4, %v2551_v33  ;;  %v820_v6 = vpop.f32.mrb[57].mxu1 }
 0x1e9   :  { %v821_v7 = vadd.f32 %v820_v6, %v2551_v33  ;;  %v1884_v8 = vpop.f32.mrb[58].mxu1  ;;  %1957 = vmatprep.mubr.bf16.mxu0 %v1053_v3 }
 0x1ea   :  { %v832_v9 = vadd.f32 %v1884_v8, %v2551_v33  ;;  %v823_v10 = vpop.f32.mrb[59].mxu1  ;;  %1958 = vmatmul.mubr.bf16.gmra.mrb[52].mxu0 %v1054_v1  ;;  %v1005_v12 = vmax.f32 %v829_v5, 0.0 }
 0x1eb   :  { %v824_v11 = vadd.f32 %v823_v10, %v2551_v33  ;;  %v1003_v14 = vmax.f32 %v821_v7, 0.0 }
 0x1ec   :  { %v1006_v13 = vmax.f32 %v832_v9, 0.0 }
 0x1ed   :  { %v1004_v15 = vmax.f32 %v824_v11, 0.0 }
 0x1ee   :  { %v1056_v16 = vpack.c.bf16 %v1006_v13, %v1005_v12 }
 0x1ef   :  { %v1055_v17 = vpack.c.bf16 %v1004_v15, %v1003_v14  ;;  %v1887_v18 = vpop.f32.mrb[60].mxu1 }
 0x1f0   :  { %v845_v19 = vadd.f32 %v1887_v18, %v2551_v33  ;;  %v836_v20 = vpop.f32.mrb[61].mxu1 }
 0x1f1   :  { %v837_v21 = vadd.f32 %v836_v20, %v2551_v33  ;;  %v1888_v22 = vpop.f32.mrb[62].mxu1  ;;  %1961 = vmatprep.mubr.bf16.mxu0 %v1055_v17 }
 0x1f2   :  { %v848_v23 = vadd.f32 %v1888_v22, %v2551_v33  ;;  %v839_v24 = vpop.f32.mrb[63].mxu1  ;;  %1962 = vmatmul.mubr.bf16.gmra.mrb[56].mxu0 %v1056_v16  ;;  %v1009_v28 = vmax.f32 %v845_v19, 0.0 }
 0x1f3   :  { %v840_v25 = vadd.f32 %v839_v24, %v2551_v33  ;;  %v1007_v34 = vmax.f32 %v837_v21, 0.0 }
 0x1f4   :  { %v1010_v29 = vmax.f32 %v848_v23, 0.0 }
 0x1f5   :  { %v1008_v35 = vmax.f32 %v840_v25, 0.0 }
 0x1f6   :  { %v1058_v36 = vpack.c.bf16 %v1010_v29, %v1009_v28 }
 0x1f7   :  { %v1057_v37 = vpack.c.bf16 %v1008_v35, %v1007_v34  ;;  %v1891_v38 = vpop.f32.mrb[64].mxu1 }
 0x1f8   :  { %v861_v39 = vadd.f32 %v1891_v38, %v2551_v33  ;;  %v852_v40 = vpop.f32.mrb[65].mxu1 }
 0x1f9   :  { %v853_v41 = vadd.f32 %v852_v40, %v2551_v33  ;;  %v1892_v43 = vpop.f32.mrb[66].mxu1  ;;  %1965 = vmatprep.mubr.bf16.mxu0 %v1057_v37 }
 0x1fa   :  { %v864_v46 = vadd.f32 %v1892_v43, %v2551_v33  ;;  %v855_v47 = vpop.f32.mrb[67].mxu1  ;;  %1966 = vmatmul.mubr.bf16.gmra.mrb[60].mxu0 %v1058_v36  ;;  %v1013_v49 = vmax.f32 %v861_v39, 0.0 }
 0x1fb   :  { %v856_v48 = vadd.f32 %v855_v47, %v2551_v33  ;;  %v1011_v45 = vmax.f32 %v853_v41, 0.0 }
 0x1fc   :  { %v1014_v50 = vmax.f32 %v864_v46, 0.0 }
 0x1fd   :  { %v1012_v30 = vmax.f32 %v856_v48, 0.0 }
 0x1fe   :  { %v1060_v63 = vpack.c.bf16 %v1014_v50, %v1013_v49 }
 0x1ff   :  { %v1059_v2 = vpack.c.bf16 %v1012_v30, %v1011_v45  ;;  %v1895_v27 = vpop.f32.mrb[68].mxu1 }
 0x200   :  { %v877_v31 = vadd.f32 %v1895_v27, %v2551_v33  ;;  %v868_v60 = vpop.f32.mrb[69].mxu1 }
 0x201   :  { %v869_v0 = vadd.f32 %v868_v60, %v2551_v33  ;;  %v1896_v26 = vpop.f32.mrb[70].mxu1  ;;  %1969 = vmatprep.mubr.bf16.mxu0 %v1059_v2 }
 0x202   :  { %v880_v32 = vadd.f32 %v1896_v26, %v2551_v33  ;;  %v871_v51 = vpop.f32.mrb[71].mxu1  ;;  %1970 = vmatmul.mubr.bf16.gmra.mrb[64].mxu0 %v1060_v63  ;;  %v1017_v53 = vmax.f32 %v877_v31, 0.0 }
 0x203   :  { %v872_v52 = vadd.f32 %v871_v51, %v2551_v33  ;;  %v1015_v55 = vmax.f32 %v869_v0, 0.0 }
 0x204   :  { %v1018_v54 = vmax.f32 %v880_v32, 0.0 }
 0x205   :  { %v1016_v56 = vmax.f32 %v872_v52, 0.0 }
 0x206   :  { %v1062_v44 = vpack.c.bf16 %v1018_v54, %v1017_v53 }
 0x207   :  { %v1061_v57 = vpack.c.bf16 %v1016_v56, %v1015_v55  ;;  %v1899_v58 = vpop.f32.mrb[72].mxu1 }
 0x208   :  { %v893_v59 = vadd.f32 %v1899_v58, %v2551_v33  ;;  %v884_v61 = vpop.f32.mrb[73].mxu1 }
 0x209   :  { %v885_v62 = vadd.f32 %v884_v61, %v2551_v33  ;;  %v1900_v1 = vpop.f32.mrb[74].mxu1  ;;  %1973 = vmatprep.mubr.bf16.mxu0 %v1061_v57 }
 0x20a   :  { %v896_v3 = vadd.f32 %v1900_v1, %v2551_v33  ;;  %v887_v4 = vpop.f32.mrb[75].mxu1  ;;  %1974 = vmatmul.mubr.bf16.gmra.mrb[68].mxu0 %v1062_v44  ;;  %v1021_v6 = vmax.f32 %v893_v59, 0.0 }
 0x20b   :  { %v888_v5 = vadd.f32 %v887_v4, %v2551_v33  ;;  %v1019_v8 = vmax.f32 %v885_v62, 0.0 }
 0x20c   :  { %v1022_v7 = vmax.f32 %v896_v3, 0.0 }
 0x20d   :  { %v1020_v9 = vmax.f32 %v888_v5, 0.0 }
 0x20e   :  { %v1064_v10 = vpack.c.bf16 %v1022_v7, %v1021_v6 }
 0x20f   :  { %v1063_v11 = vpack.c.bf16 %v1020_v9, %v1019_v8  ;;  %v1903_v12 = vpop.f32.mrb[76].mxu1 }
 0x210   :  { %v909_v13 = vadd.f32 %v1903_v12, %v2551_v33  ;;  %v900_v14 = vpop.f32.mrb[77].mxu1 }
 0x211   :  { %v901_v15 = vadd.f32 %v900_v14, %v2551_v33  ;;  %v1904_v16 = vpop.f32.mrb[78].mxu1  ;;  %1977 = vmatprep.mubr.bf16.mxu0 %v1063_v11 }
 0x212   :  { %v912_v17 = vadd.f32 %v1904_v16, %v2551_v33  ;;  %v903_v18 = vpop.f32.mrb[79].mxu1  ;;  %1978 = vmatmul.mubr.bf16.gmra.mrb[72].mxu0 %v1064_v10  ;;  %v1025_v20 = vmax.f32 %v909_v13, 0.0 }
 0x213   :  { %v904_v19 = vadd.f32 %v903_v18, %v2551_v33  ;;  %v1023_v22 = vmax.f32 %v901_v15, 0.0 }
 0x214   :  { %v1026_v21 = vmax.f32 %v912_v17, 0.0 }
 0x215   :  { %v1024_v23 = vmax.f32 %v904_v19, 0.0 }
 0x216   :  { %v1066_v24 = vpack.c.bf16 %v1026_v21, %v1025_v20  ;;  %v1077_v20 = vsub.s32 2, %v2420_v42  ;;  %v2148_v21 = vld [vmem:[%s2945_s2] sm:$0xff] }
 0x217   :  { %v1065_v25 = vpack.c.bf16 %v1024_v23, %v1023_v22  ;;  %v1907_v28 = vpop.f32.mrb[80].mxu1 }
 0x218   :  { %v925_v29 = vadd.f32 %v1907_v28, %v2551_v33  ;;  %v916_v34 = vpop.f32.mrb[81].mxu1  ;;  %v2621_v22 = vrot.slane %v2148_v21, %v1077_v20 }
 0x219   :  { %v917_v35 = vadd.f32 %v916_v34, %v2551_v33  ;;  %v1908_v36 = vpop.f32.mrb[82].mxu1  ;;  %1981 = vmatprep.mubr.bf16.mxu0 %v1065_v25 }
 0x21a   :  { %v928_v37 = vadd.f32 %v1908_v36, %v2551_v33  ;;  %v919_v38 = vpop.f32.mrb[83].mxu1  ;;  %1982 = vmatmul.mubr.bf16.gmra.mrb[76].mxu0 %v1066_v24  ;;  %v1029_v40 = vmax.f32 %v925_v29, 0.0 }
 0x21b   :  { %v920_v39 = vadd.f32 %v919_v38, %v2551_v33  ;;  %v1027_v43 = vmax.f32 %v917_v35, 0.0 }
 0x21c   :  { %v1030_v41 = vmax.f32 %v928_v37, 0.0 }
 0x21d   :  { %v1028_v46 = vmax.f32 %v920_v39, 0.0 }
 0x21e   :  { %v1068_v47 = vpack.c.bf16 %v1030_v41, %v1029_v40 }
 0x21f   :  { %v1067_v48 = vpack.c.bf16 %v1028_v46, %v1027_v43  ;;  %v1911_v49 = vpop.f32.mrb[84].mxu1 }
 0x220   :  { %v941_v50 = vadd.f32 %v1911_v49, %v2551_v33  ;;  %v932_v45 = vpop.f32.mrb[85].mxu1 }
 0x221   :  { %v933_v30 = vadd.f32 %v932_v45, %v2551_v33  ;;  %v1912_v63 = vpop.f32.mrb[86].mxu1  ;;  %1985 = vmatprep.mubr.bf16.mxu0 %v1067_v48 }
 0x222   :  { %v944_v2 = vadd.f32 %v1912_v63, %v2551_v33  ;;  %v935_v27 = vpop.f32.mrb[87].mxu1  ;;  %1986 = vmatmul.mubr.bf16.gmra.mrb[80].mxu0 %v1068_v47  ;;  %v1033_v60 = vmax.f32 %v941_v50, 0.0 }
 0x223   :  { %v936_v31 = vadd.f32 %v935_v27, %v2551_v33  ;;  %v1031_v26 = vmax.f32 %v933_v30, 0.0 }
 0x224   :  { %v1034_v0 = vmax.f32 %v944_v2, 0.0 }
 0x225   :  { %v1032_v32 = vmax.f32 %v936_v31, 0.0 }
 0x226   :  { %v1070_v51 = vpack.c.bf16 %v1034_v0, %v1033_v60 }
 0x227   :  { %v1069_v52 = vpack.c.bf16 %v1032_v32, %v1031_v26  ;;  %v1915_v53 = vpop.f32.mrb[88].mxu1 }
 0x228   :  { %v957_v54 = vadd.f32 %v1915_v53, %v2551_v33  ;;  %v948_v55 = vpop.f32.mrb[89].mxu1 }
 0x229   :  { %v949_v56 = vadd.f32 %v948_v55, %v2551_v33  ;;  %v1916_v44 = vpop.f32.mrb[90].mxu1  ;;  %1989 = vmatprep.mubr.bf16.mxu0 %v1069_v52 }
 0x22a   :  { %v960_v57 = vadd.f32 %v1916_v44, %v2551_v33  ;;  %v951_v58 = vpop.f32.mrb[91].mxu1  ;;  %1990 = vmatmul.mubr.bf16.gmra.mrb[84].mxu0 %v1070_v51  ;;  %v1037_v61 = vmax.f32 %v957_v54, 0.0 }
 0x22b   :  { %v952_v59 = vadd.f32 %v951_v58, %v2551_v33  ;;  %v1035_v1 = vmax.f32 %v949_v56, 0.0 }
 0x22c   :  { %v1038_v62 = vmax.f32 %v960_v57, 0.0 }
 0x22d   :  { %v1036_v3 = vmax.f32 %v952_v59, 0.0 }
 0x22e   :  { %v1072_v4 = vpack.c.bf16 %v1038_v62, %v1037_v61 }
 0x22f   :  { %v1071_v5 = vpack.c.bf16 %v1036_v3, %v1035_v1  ;;  %v1919_v6 = vpop.f32.mrb[92].mxu1 }
 0x230   :  { %v973_v7 = vadd.f32 %v1919_v6, %v2551_v33  ;;  %v964_v8 = vpop.f32.mrb[93].mxu1 }
 0x231   :  { %v965_v9 = vadd.f32 %v964_v8, %v2551_v33  ;;  %v1920_v10 = vpop.f32.mrb[94].mxu1  ;;  %1993 = vmatprep.mubr.bf16.mxu0 %v1071_v5 }
 0x232   :  { %v976_v11 = vadd.f32 %v1920_v10, %v2551_v33  ;;  %v967_v12 = vpop.f32.mrb[95].mxu1  ;;  %1994 = vmatmul.mubr.bf16.gmra.mrb[88].mxu0 %v1072_v4  ;;  %v1041_v14 = vmax.f32 %v973_v7, 0.0 }
 0x233   :  { %v968_v13 = vadd.f32 %v967_v12, %v2551_v33  ;;  %v1039_v16 = vmax.f32 %v965_v9, 0.0 }
 0x234   :  { %v1042_v15 = vmax.f32 %v976_v11, 0.0 }
 0x235   :  { %v1040_v17 = vmax.f32 %v968_v13, 0.0 }
 0x236   :  { %v1074_v18 = vpack.c.bf16 %v1042_v15, %v1041_v14 }
 0x237   :  { %v1073_v19 = vpack.c.bf16 %v1040_v17, %v1039_v16 }
 0x239   :  { %1997 = vmatprep.mubr.bf16.mxu0 %v1073_v19 }
 0x23a   :  { %1998 = vmatmul.mubr.bf16.gmra.mrb[92].mxu0 %v1074_v18 }
 0x295   :  { %v1939_v23 = vpop.f32.mrb[32].mxu0 }
 0x296   :  { %v1170_v24 = vadd.f32 %v1939_v23, %v2621_v22  ;;  %v1161_v33 = vpop.f32.mrb[33].mxu0 }
 0x297   :  { %v1162_v25 = vadd.f32 %v1161_v33, %v2621_v22  ;;  %v1940_v28 = vpop.f32.mrb[34].mxu0 }
 0x298   :  { %2020 = vtanh.f32 %v1170_v24  ;;  %v1173_v29 = vadd.f32 %v1940_v28, %v2621_v22  ;;  %v1164_v34 = vpop.f32.mrb[35].mxu0 }
 0x299   :  { %2022 = vtanh.f32 %v1162_v25  ;;  %v1165_v42 = vadd.f32 %v1164_v34, %v2621_v22 }
 0x29a   :  { %2024 = vtanh.f32 %v1173_v29 }
 0x29b   :  { %2026 = vtanh.f32 %v1165_v42 }
 0x29d   :  { %v1943_v35 = vpop.f32.mrb[36].mxu0 }
 0x29e   :  { %v1186_v36 = vadd.f32 %v1943_v35, %v2621_v22  ;;  %v1177_v37 = vpop.f32.mrb[37].mxu0 }
 0x29f   :  { %v1178_v38 = vadd.f32 %v1177_v37, %v2621_v22  ;;  %v1944_v39 = vpop.f32.mrb[38].mxu0 }
 0x2a0   :  { %2028 = vtanh.f32 %v1186_v36  ;;  %v1189_v40 = vadd.f32 %v1944_v39, %v2621_v22  ;;  %v1180_v41 = vpop.f32.mrb[39].mxu0 }
 0x2a1   :  { %2030 = vtanh.f32 %v1178_v38  ;;  %v1181_v43 = vadd.f32 %v1180_v41, %v2621_v22 }
 0x2a2   :  { %v2021_v46 = vpop.eup %2020  ;;  %2032 = vtanh.f32 %v1189_v40 }
 0x2a3   :  { %v2023_v47 = vpop.eup %2022  ;;  %v1482_v48 = vmul.f32 2.0, %v2021_v46  ;;  %2034 = vtanh.f32 %v1181_v43 }
 0x2a4   :  { %v2025_v49 = vpop.eup %2024  ;;  %v1480_v50 = vmul.f32 2.0, %v2023_v47 }
 0x2a5   :  { %v2027_v45 = vpop.eup %2026  ;;  %1547 = vst.msk [vmem:[%s2946_s3 + $0x10] sm:$0xff] %vm1544_vm1, %v1482_v48  ;;  %v1483_v30 = vmul.f32 2.0, %v2025_v49  ;;  %v1947_v63 = vpop.f32.mrb[40].mxu0 }
 0x2a6   :  { %1545 = vst.msk [vmem:[%s2946_s3] sm:$0xff] %vm1544_vm1, %v1480_v50  ;;  %v1481_v2 = vmul.f32 2.0, %v2027_v45  ;;  %v1202_v27 = vadd.f32 %v1947_v63, %v2621_v22  ;;  %v1193_v31 = vpop.f32.mrb[41].mxu0 }
 0x2a7   :  { %1548 = vst.msk [vmem:[%s2946_s3 + $0x18] sm:$0xff] %vm1544_vm1, %v1483_v30  ;;  %v1194_v60 = vadd.f32 %v1193_v31, %v2621_v22  ;;  %v1948_v0 = vpop.f32.mrb[42].mxu0 }
 0x2a8   :  { %1546 = vst.msk [vmem:[%s2946_s3 + $0x8] sm:$0xff] %vm1544_vm1, %v1481_v2  ;;  %2036 = vtanh.f32 %v1202_v27  ;;  %v1205_v26 = vadd.f32 %v1948_v0, %v2621_v22  ;;  %v1196_v32 = vpop.f32.mrb[43].mxu0 }
 0x2a9   :  { %2038 = vtanh.f32 %v1194_v60  ;;  %v1197_v51 = vadd.f32 %v1196_v32, %v2621_v22 }
 0x2aa   :  { %v2029_v52 = vpop.eup %2028  ;;  %2040 = vtanh.f32 %v1205_v26 }
 0x2ab   :  { %v2031_v53 = vpop.eup %2030  ;;  %v1486_v54 = vmul.f32 2.0, %v2029_v52  ;;  %2042 = vtanh.f32 %v1197_v51 }
 0x2ac   :  { %v2033_v55 = vpop.eup %2032  ;;  %v1484_v56 = vmul.f32 2.0, %v2031_v53 }
 0x2ad   :  { %v2035_v44 = vpop.eup %2034  ;;  %1551 = vst.msk [vmem:[%s2946_s3 + $0x30] sm:$0xff] %vm1544_vm1, %v1486_v54  ;;  %v1487_v57 = vmul.f32 2.0, %v2033_v55  ;;  %v1951_v58 = vpop.f32.mrb[44].mxu0 }
 0x2ae   :  { %1549 = vst.msk [vmem:[%s2946_s3 + $0x20] sm:$0xff] %vm1544_vm1, %v1484_v56  ;;  %v1485_v59 = vmul.f32 2.0, %v2035_v44  ;;  %v1218_v61 = vadd.f32 %v1951_v58, %v2621_v22  ;;  %v1209_v62 = vpop.f32.mrb[45].mxu0 }
 0x2af   :  { %1552 = vst.msk [vmem:[%s2946_s3 + $0x38] sm:$0xff] %vm1544_vm1, %v1487_v57  ;;  %v1210_v1 = vadd.f32 %v1209_v62, %v2621_v22  ;;  %v1952_v3 = vpop.f32.mrb[46].mxu0 }
 0x2b0   :  { %1550 = vst.msk [vmem:[%s2946_s3 + $0x28] sm:$0xff] %vm1544_vm1, %v1485_v59  ;;  %2044 = vtanh.f32 %v1218_v61  ;;  %v1221_v4 = vadd.f32 %v1952_v3, %v2621_v22  ;;  %v1212_v5 = vpop.f32.mrb[47].mxu0 }
 0x2b1   :  { %2046 = vtanh.f32 %v1210_v1  ;;  %v1213_v6 = vadd.f32 %v1212_v5, %v2621_v22 }
 0x2b2   :  { %v2037_v7 = vpop.eup %2036  ;;  %2048 = vtanh.f32 %v1221_v4 }
 0x2b3   :  { %v2039_v8 = vpop.eup %2038  ;;  %v1490_v9 = vmul.f32 2.0, %v2037_v7  ;;  %2050 = vtanh.f32 %v1213_v6 }
 0x2b4   :  { %v2041_v10 = vpop.eup %2040  ;;  %v1488_v11 = vmul.f32 2.0, %v2039_v8 }
 0x2b5   :  { %v2043_v12 = vpop.eup %2042  ;;  %1555 = vst.msk [vmem:[%s2946_s3 + $0x50] sm:$0xff] %vm1544_vm1, %v1490_v9  ;;  %v1491_v13 = vmul.f32 2.0, %v2041_v10  ;;  %v1955_v14 = vpop.f32.mrb[48].mxu0 }
 0x2b6   :  { %1553 = vst.msk [vmem:[%s2946_s3 + $0x40] sm:$0xff] %vm1544_vm1, %v1488_v11  ;;  %v1489_v15 = vmul.f32 2.0, %v2043_v12  ;;  %v1234_v16 = vadd.f32 %v1955_v14, %v2621_v22  ;;  %v1225_v17 = vpop.f32.mrb[49].mxu0 }
 0x2b7   :  { %1556 = vst.msk [vmem:[%s2946_s3 + $0x58] sm:$0xff] %vm1544_vm1, %v1491_v13  ;;  %v1226_v18 = vadd.f32 %v1225_v17, %v2621_v22  ;;  %v1956_v19 = vpop.f32.mrb[50].mxu0 }
 0x2b8   :  { %1554 = vst.msk [vmem:[%s2946_s3 + $0x48] sm:$0xff] %vm1544_vm1, %v1489_v15  ;;  %2052 = vtanh.f32 %v1234_v16  ;;  %v1237_v20 = vadd.f32 %v1956_v19, %v2621_v22  ;;  %v1228_v21 = vpop.f32.mrb[51].mxu0 }
 0x2b9   :  { %2054 = vtanh.f32 %v1226_v18  ;;  %v1229_v23 = vadd.f32 %v1228_v21, %v2621_v22 }
 0x2ba   :  { %v2045_v24 = vpop.eup %2044  ;;  %2056 = vtanh.f32 %v1237_v20 }
 0x2bb   :  { %v2047_v33 = vpop.eup %2046  ;;  %v1494_v25 = vmul.f32 2.0, %v2045_v24  ;;  %2058 = vtanh.f32 %v1229_v23 }
 0x2bc   :  { %v2049_v28 = vpop.eup %2048  ;;  %v1492_v29 = vmul.f32 2.0, %v2047_v33 }
 0x2bd   :  { %v2051_v34 = vpop.eup %2050  ;;  %1559 = vst.msk [vmem:[%s2946_s3 + $0x70] sm:$0xff] %vm1544_vm1, %v1494_v25  ;;  %v1495_v42 = vmul.f32 2.0, %v2049_v28  ;;  %v1959_v35 = vpop.f32.mrb[52].mxu0 }
 0x2be   :  { %1557 = vst.msk [vmem:[%s2946_s3 + $0x60] sm:$0xff] %vm1544_vm1, %v1492_v29  ;;  %v1493_v36 = vmul.f32 2.0, %v2051_v34  ;;  %v1250_v37 = vadd.f32 %v1959_v35, %v2621_v22  ;;  %v1241_v38 = vpop.f32.mrb[53].mxu0 }
 0x2bf   :  { %1560 = vst.msk [vmem:[%s2946_s3 + $0x78] sm:$0xff] %vm1544_vm1, %v1495_v42  ;;  %v1242_v39 = vadd.f32 %v1241_v38, %v2621_v22  ;;  %v1960_v40 = vpop.f32.mrb[54].mxu0 }
 0x2c0   :  { %1558 = vst.msk [vmem:[%s2946_s3 + $0x68] sm:$0xff] %vm1544_vm1, %v1493_v36  ;;  %2060 = vtanh.f32 %v1250_v37  ;;  %v1253_v41 = vadd.f32 %v1960_v40, %v2621_v22  ;;  %v1244_v43 = vpop.f32.mrb[55].mxu0 }
 0x2c1   :  { %2062 = vtanh.f32 %v1242_v39  ;;  %v1245_v46 = vadd.f32 %v1244_v43, %v2621_v22 }
 0x2c2   :  { %v2053_v47 = vpop.eup %2052  ;;  %2064 = vtanh.f32 %v1253_v41 }
 0x2c3   :  { %v2055_v48 = vpop.eup %2054  ;;  %v1498_v49 = vmul.f32 2.0, %v2053_v47  ;;  %2066 = vtanh.f32 %v1245_v46 }
 0x2c4   :  { %v2057_v50 = vpop.eup %2056  ;;  %v1496_v45 = vmul.f32 2.0, %v2055_v48 }
 0x2c5   :  { %v2059_v30 = vpop.eup %2058  ;;  %1563 = vst.msk [vmem:[%s2946_s3 + $0x90] sm:$0xff] %vm1544_vm1, %v1498_v49  ;;  %v1499_v63 = vmul.f32 2.0, %v2057_v50  ;;  %v1963_v2 = vpop.f32.mrb[56].mxu0 }
 0x2c6   :  { %1561 = vst.msk [vmem:[%s2946_s3 + $0x80] sm:$0xff] %vm1544_vm1, %v1496_v45  ;;  %v1497_v27 = vmul.f32 2.0, %v2059_v30  ;;  %v1266_v31 = vadd.f32 %v1963_v2, %v2621_v22  ;;  %v1257_v60 = vpop.f32.mrb[57].mxu0 }
 0x2c7   :  { %1564 = vst.msk [vmem:[%s2946_s3 + $0x98] sm:$0xff] %vm1544_vm1, %v1499_v63  ;;  %v1258_v0 = vadd.f32 %v1257_v60, %v2621_v22  ;;  %v1964_v26 = vpop.f32.mrb[58].mxu0 }
 0x2c8   :  { %1562 = vst.msk [vmem:[%s2946_s3 + $0x88] sm:$0xff] %vm1544_vm1, %v1497_v27  ;;  %2068 = vtanh.f32 %v1266_v31  ;;  %v1269_v32 = vadd.f32 %v1964_v26, %v2621_v22  ;;  %v1260_v51 = vpop.f32.mrb[59].mxu0 }
 0x2c9   :  { %2070 = vtanh.f32 %v1258_v0  ;;  %v1261_v52 = vadd.f32 %v1260_v51, %v2621_v22 }
 0x2ca   :  { %v2061_v53 = vpop.eup %2060  ;;  %2072 = vtanh.f32 %v1269_v32 }
 0x2cb   :  { %v2063_v54 = vpop.eup %2062  ;;  %v1502_v55 = vmul.f32 2.0, %v2061_v53  ;;  %2074 = vtanh.f32 %v1261_v52 }
 0x2cc   :  { %v2065_v56 = vpop.eup %2064  ;;  %v1500_v44 = vmul.f32 2.0, %v2063_v54 }
 0x2cd   :  { %v2067_v57 = vpop.eup %2066  ;;  %1567 = vst.msk [vmem:[%s2946_s3 + $0xb0] sm:$0xff] %vm1544_vm1, %v1502_v55  ;;  %v1503_v58 = vmul.f32 2.0, %v2065_v56  ;;  %v1967_v59 = vpop.f32.mrb[60].mxu0 }
 0x2ce   :  { %1565 = vst.msk [vmem:[%s2946_s3 + $0xa0] sm:$0xff] %vm1544_vm1, %v1500_v44  ;;  %v1501_v61 = vmul.f32 2.0, %v2067_v57  ;;  %v1282_v62 = vadd.f32 %v1967_v59, %v2621_v22  ;;  %v1273_v1 = vpop.f32.mrb[61].mxu0 }
 0x2cf   :  { %1568 = vst.msk [vmem:[%s2946_s3 + $0xb8] sm:$0xff] %vm1544_vm1, %v1503_v58  ;;  %v1274_v3 = vadd.f32 %v1273_v1, %v2621_v22  ;;  %v1968_v4 = vpop.f32.mrb[62].mxu0 }
 0x2d0   :  { %1566 = vst.msk [vmem:[%s2946_s3 + $0xa8] sm:$0xff] %vm1544_vm1, %v1501_v61  ;;  %2076 = vtanh.f32 %v1282_v62  ;;  %v1285_v5 = vadd.f32 %v1968_v4, %v2621_v22  ;;  %v1276_v6 = vpop.f32.mrb[63].mxu0 }
 0x2d1   :  { %2078 = vtanh.f32 %v1274_v3  ;;  %v1277_v7 = vadd.f32 %v1276_v6, %v2621_v22 }
 0x2d2   :  { %v2069_v8 = vpop.eup %2068  ;;  %2080 = vtanh.f32 %v1285_v5 }
 0x2d3   :  { %v2071_v9 = vpop.eup %2070  ;;  %v1506_v10 = vmul.f32 2.0, %v2069_v8  ;;  %2082 = vtanh.f32 %v1277_v7 }
 0x2d4   :  { %v2073_v11 = vpop.eup %2072  ;;  %v1504_v12 = vmul.f32 2.0, %v2071_v9 }
 0x2d5   :  { %v2075_v13 = vpop.eup %2074  ;;  %1571 = vst.msk [vmem:[%s2946_s3 + $0xd0] sm:$0xff] %vm1544_vm1, %v1506_v10  ;;  %v1507_v14 = vmul.f32 2.0, %v2073_v11  ;;  %v1971_v15 = vpop.f32.mrb[64].mxu0 }
 0x2d6   :  { %1569 = vst.msk [vmem:[%s2946_s3 + $0xc0] sm:$0xff] %vm1544_vm1, %v1504_v12  ;;  %v1505_v16 = vmul.f32 2.0, %v2075_v13  ;;  %v1298_v17 = vadd.f32 %v1971_v15, %v2621_v22  ;;  %v1289_v18 = vpop.f32.mrb[65].mxu0 }
 0x2d7   :  { %1572 = vst.msk [vmem:[%s2946_s3 + $0xd8] sm:$0xff] %vm1544_vm1, %v1507_v14  ;;  %v1290_v19 = vadd.f32 %v1289_v18, %v2621_v22  ;;  %v1972_v20 = vpop.f32.mrb[66].mxu0 }
 0x2d8   :  { %1570 = vst.msk [vmem:[%s2946_s3 + $0xc8] sm:$0xff] %vm1544_vm1, %v1505_v16  ;;  %2084 = vtanh.f32 %v1298_v17  ;;  %v1301_v21 = vadd.f32 %v1972_v20, %v2621_v22  ;;  %v1292_v23 = vpop.f32.mrb[67].mxu0 }
 0x2d9   :  { %2086 = vtanh.f32 %v1290_v19  ;;  %v1293_v24 = vadd.f32 %v1292_v23, %v2621_v22 }
 0x2da   :  { %v2077_v33 = vpop.eup %2076  ;;  %2088 = vtanh.f32 %v1301_v21 }
 0x2db   :  { %v2079_v25 = vpop.eup %2078  ;;  %v1510_v28 = vmul.f32 2.0, %v2077_v33  ;;  %2090 = vtanh.f32 %v1293_v24 }
 0x2dc   :  { %v2081_v29 = vpop.eup %2080  ;;  %v1508_v34 = vmul.f32 2.0, %v2079_v25 }
 0x2dd   :  { %v2083_v42 = vpop.eup %2082  ;;  %1575 = vst.msk [vmem:[%s2946_s3 + $0xf0] sm:$0xff] %vm1544_vm1, %v1510_v28  ;;  %v1511_v35 = vmul.f32 2.0, %v2081_v29  ;;  %v1975_v36 = vpop.f32.mrb[68].mxu0 }
 0x2de   :  { %1573 = vst.msk [vmem:[%s2946_s3 + $0xe0] sm:$0xff] %vm1544_vm1, %v1508_v34  ;;  %v1509_v37 = vmul.f32 2.0, %v2083_v42  ;;  %v1314_v38 = vadd.f32 %v1975_v36, %v2621_v22  ;;  %v1305_v39 = vpop.f32.mrb[69].mxu0 }
 0x2df   :  { %1576 = vst.msk [vmem:[%s2946_s3 + $0xf8] sm:$0xff] %vm1544_vm1, %v1511_v35  ;;  %v1306_v40 = vadd.f32 %v1305_v39, %v2621_v22  ;;  %v1976_v41 = vpop.f32.mrb[70].mxu0 }
 0x2e0   :  { %1574 = vst.msk [vmem:[%s2946_s3 + $0xe8] sm:$0xff] %vm1544_vm1, %v1509_v37  ;;  %2092 = vtanh.f32 %v1314_v38  ;;  %v1317_v43 = vadd.f32 %v1976_v41, %v2621_v22  ;;  %v1308_v46 = vpop.f32.mrb[71].mxu0 }
 0x2e1   :  { %2094 = vtanh.f32 %v1306_v40  ;;  %v1309_v47 = vadd.f32 %v1308_v46, %v2621_v22 }
 0x2e2   :  { %v2085_v48 = vpop.eup %2084  ;;  %2096 = vtanh.f32 %v1317_v43 }
 0x2e3   :  { %v2087_v49 = vpop.eup %2086  ;;  %v1514_v50 = vmul.f32 2.0, %v2085_v48  ;;  %2098 = vtanh.f32 %v1309_v47 }
 0x2e4   :  { %v2089_v45 = vpop.eup %2088  ;;  %v1512_v30 = vmul.f32 2.0, %v2087_v49 }
 0x2e5   :  { %v2091_v63 = vpop.eup %2090  ;;  %1579 = vst.msk [vmem:[%s2946_s3 + $0x110] sm:$0xff] %vm1544_vm1, %v1514_v50  ;;  %v1515_v2 = vmul.f32 2.0, %v2089_v45  ;;  %v1979_v27 = vpop.f32.mrb[72].mxu0 }
 0x2e6   :  { %1577 = vst.msk [vmem:[%s2946_s3 + $0x100] sm:$0xff] %vm1544_vm1, %v1512_v30  ;;  %v1513_v31 = vmul.f32 2.0, %v2091_v63  ;;  %v1330_v60 = vadd.f32 %v1979_v27, %v2621_v22  ;;  %v1321_v0 = vpop.f32.mrb[73].mxu0 }
 0x2e7   :  { %1580 = vst.msk [vmem:[%s2946_s3 + $0x118] sm:$0xff] %vm1544_vm1, %v1515_v2  ;;  %v1322_v26 = vadd.f32 %v1321_v0, %v2621_v22  ;;  %v1980_v32 = vpop.f32.mrb[74].mxu0 }
 0x2e8   :  { %1578 = vst.msk [vmem:[%s2946_s3 + $0x108] sm:$0xff] %vm1544_vm1, %v1513_v31  ;;  %2100 = vtanh.f32 %v1330_v60  ;;  %v1333_v51 = vadd.f32 %v1980_v32, %v2621_v22  ;;  %v1324_v52 = vpop.f32.mrb[75].mxu0 }
 0x2e9   :  { %2102 = vtanh.f32 %v1322_v26  ;;  %v1325_v53 = vadd.f32 %v1324_v52, %v2621_v22 }
 0x2ea   :  { %v2093_v54 = vpop.eup %2092  ;;  %2104 = vtanh.f32 %v1333_v51 }
 0x2eb   :  { %v2095_v55 = vpop.eup %2094  ;;  %v1518_v56 = vmul.f32 2.0, %v2093_v54  ;;  %2106 = vtanh.f32 %v1325_v53 }
 0x2ec   :  { %v2097_v44 = vpop.eup %2096  ;;  %v1516_v57 = vmul.f32 2.0, %v2095_v55 }
 0x2ed   :  { %v2099_v58 = vpop.eup %2098  ;;  %1583 = vst.msk [vmem:[%s2946_s3 + $0x130] sm:$0xff] %vm1544_vm1, %v1518_v56  ;;  %v1519_v59 = vmul.f32 2.0, %v2097_v44  ;;  %v1983_v61 = vpop.f32.mrb[76].mxu0 }
 0x2ee   :  { %1581 = vst.msk [vmem:[%s2946_s3 + $0x120] sm:$0xff] %vm1544_vm1, %v1516_v57  ;;  %v1517_v62 = vmul.f32 2.0, %v2099_v58  ;;  %v1346_v1 = vadd.f32 %v1983_v61, %v2621_v22  ;;  %v1337_v3 = vpop.f32.mrb[77].mxu0 }
 0x2ef   :  { %1584 = vst.msk [vmem:[%s2946_s3 + $0x138] sm:$0xff] %vm1544_vm1, %v1519_v59  ;;  %v1338_v4 = vadd.f32 %v1337_v3, %v2621_v22  ;;  %v1984_v5 = vpop.f32.mrb[78].mxu0 }
 0x2f0   :  { %1582 = vst.msk [vmem:[%s2946_s3 + $0x128] sm:$0xff] %vm1544_vm1, %v1517_v62  ;;  %2108 = vtanh.f32 %v1346_v1  ;;  %v1349_v6 = vadd.f32 %v1984_v5, %v2621_v22  ;;  %v1340_v7 = vpop.f32.mrb[79].mxu0 }
 0x2f1   :  { %2110 = vtanh.f32 %v1338_v4  ;;  %v1341_v8 = vadd.f32 %v1340_v7, %v2621_v22 }
 0x2f2   :  { %v2101_v9 = vpop.eup %2100  ;;  %2112 = vtanh.f32 %v1349_v6 }
 0x2f3   :  { %v2103_v10 = vpop.eup %2102  ;;  %v1522_v11 = vmul.f32 2.0, %v2101_v9  ;;  %2114 = vtanh.f32 %v1341_v8 }
 0x2f4   :  { %v2105_v12 = vpop.eup %2104  ;;  %v1520_v13 = vmul.f32 2.0, %v2103_v10 }
 0x2f5   :  { %v2107_v14 = vpop.eup %2106  ;;  %1587 = vst.msk [vmem:[%s2946_s3 + $0x150] sm:$0xff] %vm1544_vm1, %v1522_v11  ;;  %v1523_v15 = vmul.f32 2.0, %v2105_v12  ;;  %v1987_v16 = vpop.f32.mrb[80].mxu0 }
 0x2f6   :  { %1585 = vst.msk [vmem:[%s2946_s3 + $0x140] sm:$0xff] %vm1544_vm1, %v1520_v13  ;;  %v1521_v17 = vmul.f32 2.0, %v2107_v14  ;;  %v1362_v18 = vadd.f32 %v1987_v16, %v2621_v22  ;;  %v1353_v19 = vpop.f32.mrb[81].mxu0 }
 0x2f7   :  { %1588 = vst.msk [vmem:[%s2946_s3 + $0x158] sm:$0xff] %vm1544_vm1, %v1523_v15  ;;  %v1354_v20 = vadd.f32 %v1353_v19, %v2621_v22  ;;  %v1988_v21 = vpop.f32.mrb[82].mxu0 }
 0x2f8   :  { %1586 = vst.msk [vmem:[%s2946_s3 + $0x148] sm:$0xff] %vm1544_vm1, %v1521_v17  ;;  %2116 = vtanh.f32 %v1362_v18  ;;  %v1365_v23 = vadd.f32 %v1988_v21, %v2621_v22  ;;  %v1356_v24 = vpop.f32.mrb[83].mxu0 }
 0x2f9   :  { %2118 = vtanh.f32 %v1354_v20  ;;  %v1357_v33 = vadd.f32 %v1356_v24, %v2621_v22 }
 0x2fa   :  { %v2109_v25 = vpop.eup %2108  ;;  %2120 = vtanh.f32 %v1365_v23 }
 0x2fb   :  { %v2111_v28 = vpop.eup %2110  ;;  %v1526_v29 = vmul.f32 2.0, %v2109_v25  ;;  %2122 = vtanh.f32 %v1357_v33 }
 0x2fc   :  { %v2113_v34 = vpop.eup %2112  ;;  %v1524_v42 = vmul.f32 2.0, %v2111_v28 }
 0x2fd   :  { %v2115_v35 = vpop.eup %2114  ;;  %1591 = vst.msk [vmem:[%s2946_s3 + $0x170] sm:$0xff] %vm1544_vm1, %v1526_v29  ;;  %v1527_v36 = vmul.f32 2.0, %v2113_v34  ;;  %v1991_v37 = vpop.f32.mrb[84].mxu0 }
 0x2fe   :  { %1589 = vst.msk [vmem:[%s2946_s3 + $0x160] sm:$0xff] %vm1544_vm1, %v1524_v42  ;;  %v1525_v38 = vmul.f32 2.0, %v2115_v35  ;;  %v1378_v39 = vadd.f32 %v1991_v37, %v2621_v22  ;;  %v1369_v40 = vpop.f32.mrb[85].mxu0 }
 0x2ff   :  { %1592 = vst.msk [vmem:[%s2946_s3 + $0x178] sm:$0xff] %vm1544_vm1, %v1527_v36  ;;  %v1370_v41 = vadd.f32 %v1369_v40, %v2621_v22  ;;  %v1992_v43 = vpop.f32.mrb[86].mxu0 }
 0x300   :  { %1590 = vst.msk [vmem:[%s2946_s3 + $0x168] sm:$0xff] %vm1544_vm1, %v1525_v38  ;;  %2124 = vtanh.f32 %v1378_v39  ;;  %v1381_v46 = vadd.f32 %v1992_v43, %v2621_v22  ;;  %v1372_v47 = vpop.f32.mrb[87].mxu0 }
 0x301   :  { %2126 = vtanh.f32 %v1370_v41  ;;  %v1373_v48 = vadd.f32 %v1372_v47, %v2621_v22 }
 0x302   :  { %v2117_v49 = vpop.eup %2116  ;;  %2128 = vtanh.f32 %v1381_v46 }
 0x303   :  { %v2119_v50 = vpop.eup %2118  ;;  %v1530_v45 = vmul.f32 2.0, %v2117_v49  ;;  %2130 = vtanh.f32 %v1373_v48 }
 0x304   :  { %v2121_v30 = vpop.eup %2120  ;;  %v1528_v63 = vmul.f32 2.0, %v2119_v50 }
 0x305   :  { %v2123_v2 = vpop.eup %2122  ;;  %1595 = vst.msk [vmem:[%s2946_s3 + $0x190] sm:$0xff] %vm1544_vm1, %v1530_v45  ;;  %v1531_v27 = vmul.f32 2.0, %v2121_v30  ;;  %v1995_v31 = vpop.f32.mrb[88].mxu0 }
 0x306   :  { %1593 = vst.msk [vmem:[%s2946_s3 + $0x180] sm:$0xff] %vm1544_vm1, %v1528_v63  ;;  %v1529_v60 = vmul.f32 2.0, %v2123_v2  ;;  %v1394_v0 = vadd.f32 %v1995_v31, %v2621_v22  ;;  %v1385_v26 = vpop.f32.mrb[89].mxu0 }
 0x307   :  { %1596 = vst.msk [vmem:[%s2946_s3 + $0x198] sm:$0xff] %vm1544_vm1, %v1531_v27  ;;  %v1386_v32 = vadd.f32 %v1385_v26, %v2621_v22  ;;  %v1996_v51 = vpop.f32.mrb[90].mxu0 }
 0x308   :  { %1594 = vst.msk [vmem:[%s2946_s3 + $0x188] sm:$0xff] %vm1544_vm1, %v1529_v60  ;;  %2132 = vtanh.f32 %v1394_v0  ;;  %v1397_v52 = vadd.f32 %v1996_v51, %v2621_v22  ;;  %v1388_v53 = vpop.f32.mrb[91].mxu0 }
 0x309   :  { %2134 = vtanh.f32 %v1386_v32  ;;  %v1389_v54 = vadd.f32 %v1388_v53, %v2621_v22 }
 0x30a   :  { %v2125_v55 = vpop.eup %2124  ;;  %2136 = vtanh.f32 %v1397_v52 }
 0x30b   :  { %v2127_v56 = vpop.eup %2126  ;;  %v1534_v44 = vmul.f32 2.0, %v2125_v55  ;;  %2138 = vtanh.f32 %v1389_v54 }
 0x30c   :  { %v2129_v57 = vpop.eup %2128  ;;  %v1532_v58 = vmul.f32 2.0, %v2127_v56 }
 0x30d   :  { %v2131_v59 = vpop.eup %2130  ;;  %1599 = vst.msk [vmem:[%s2946_s3 + $0x1b0] sm:$0xff] %vm1544_vm1, %v1534_v44  ;;  %v1535_v61 = vmul.f32 2.0, %v2129_v57  ;;  %v1999_v62 = vpop.f32.mrb[92].mxu0 }
 0x30e   :  { %1597 = vst.msk [vmem:[%s2946_s3 + $0x1a0] sm:$0xff] %vm1544_vm1, %v1532_v58  ;;  %v1533_v1 = vmul.f32 2.0, %v2131_v59  ;;  %v1410_v3 = vadd.f32 %v1999_v62, %v2621_v22  ;;  %v1401_v4 = vpop.f32.mrb[93].mxu0 }
 0x30f   :  { %1600 = vst.msk [vmem:[%s2946_s3 + $0x1b8] sm:$0xff] %vm1544_vm1, %v1535_v61  ;;  %v1402_v5 = vadd.f32 %v1401_v4, %v2621_v22  ;;  %v2000_v6 = vpop.f32.mrb[94].mxu0 }
 0x310   :  { %1598 = vst.msk [vmem:[%s2946_s3 + $0x1a8] sm:$0xff] %vm1544_vm1, %v1533_v1  ;;  %2140 = vtanh.f32 %v1410_v3  ;;  %v1413_v7 = vadd.f32 %v2000_v6, %v2621_v22  ;;  %v1404_v8 = vpop.f32.mrb[95].mxu0 }
 0x311   :  { %2142 = vtanh.f32 %v1402_v5  ;;  %v1405_v9 = vadd.f32 %v1404_v8, %v2621_v22 }
 0x312   :  { %v2133_v10 = vpop.eup %2132  ;;  %2144 = vtanh.f32 %v1413_v7 }
 0x313   :  { %v2135_v11 = vpop.eup %2134  ;;  %v1538_v12 = vmul.f32 2.0, %v2133_v10  ;;  %2146 = vtanh.f32 %v1405_v9 }
 0x314   :  { %v2137_v13 = vpop.eup %2136  ;;  %v1536_v14 = vmul.f32 2.0, %v2135_v11 }
 0x315   :  { %v2139_v15 = vpop.eup %2138  ;;  %1603 = vst.msk [vmem:[%s2946_s3 + $0x1d0] sm:$0xff] %vm1544_vm1, %v1538_v12  ;;  %v1539_v16 = vmul.f32 2.0, %v2137_v13 }
 0x316   :  { %1601 = vst.msk [vmem:[%s2946_s3 + $0x1c0] sm:$0xff] %vm1544_vm1, %v1536_v14  ;;  %v1537_v22 = vmul.f32 2.0, %v2139_v15 }
 0x317   :  { %1604 = vst.msk [vmem:[%s2946_s3 + $0x1d8] sm:$0xff] %vm1544_vm1, %v1539_v16 }
 0x318   :  { %1602 = vst.msk [vmem:[%s2946_s3 + $0x1c8] sm:$0xff] %vm1544_vm1, %v1537_v22 }
 0x31a   :  { %v2141_v17 = vpop.eup %2140 }
 0x31b   :  { %v2143_v18 = vpop.eup %2142  ;;  %v1542_v19 = vmul.f32 2.0, %v2141_v17 }
 0x31c   :  { %v2145_v20 = vpop.eup %2144  ;;  %v1540_v21 = vmul.f32 2.0, %v2143_v18 }
 0x31d   :  { %v2147_v23 = vpop.eup %2146  ;;  %1607 = vst.msk [vmem:[%s2946_s3 + $0x1f0] sm:$0xff] %vm1544_vm1, %v1542_v19  ;;  %v1543_v24 = vmul.f32 2.0, %v2145_v20 }
 0x31e   :  { %1605 = vst.msk [vmem:[%s2946_s3 + $0x1e0] sm:$0xff] %vm1544_vm1, %v1540_v21  ;;  %v1541_v33 = vmul.f32 2.0, %v2147_v23 }
 0x31f   :  { %1608 = vst.msk [vmem:[%s2946_s3 + $0x1f8] sm:$0xff] %vm1544_vm1, %v1543_v24 }
 0x320   :  { %1606 = vst.msk [vmem:[%s2946_s3 + $0x1e8] sm:$0xff] %vm1544_vm1, %v1541_v33 }

</bundles_post_ra>
